<compile_context>
chip_gen: v6e
topology: v6e:2x2x1
jax: 0.10.0
libtpu: 0.0.40
codegen_flags: <defaults>
</compile_context>

<pallas_src>
import functools

import jax
import jax.numpy as jnp
from jax.experimental import pallas as pl
from jax.experimental.pallas import tpu as pltpu

EPS = 1e-5
NEG_SLOPE = 0.01  # nn.LeakyReLU default


def _round_up(x, m):
    return (x + m - 1) // m * m


# --------------------------------------------------------------------------------------
# Kernel: 6 x (Linear(+folded BN) -> LeakyReLU) then classifier Linear. Fully unrolled.
# --------------------------------------------------------------------------------------
def mlp_kernel(x_ref, wh_ref, bh_ref, wo_ref, bo_ref, out_ref):
    h = x_ref[...]                                         # [TB, HID_PAD] f32
    n_hidden = wh_ref.shape[0]                             # static (=6)
    for li in range(n_hidden):                             # unrolled -> full LLO visibility
        w = wh_ref[li]                                     # [HID_PAD, HID_PAD] (f32 or bf16)
        h = jnp.dot(h.astype(w.dtype), w, preferred_element_type=jnp.float32)
        h = h + bh_ref[li]                                 # bias stays f32
        h = jnp.where(h > 0, h, NEG_SLOPE * h)             # LeakyReLU in f32 (v5e-friendly)
    w = wo_ref[...]                                        # [HID_PAD, OUT_PAD]
    logits = jnp.dot(h.astype(w.dtype), w, preferred_element_type=jnp.float32) + bo_ref[...]
    out_ref[...] = logits.astype(out_ref.dtype)


# --------------------------------------------------------------------------------------
# Parameter initialization (mirrors the PyTorch module; Linear weights stored [in, out])
# --------------------------------------------------------------------------------------
def init_params(key, input_size, num_features, num_classes):
    dims = [input_size] + list(num_features) + [num_classes]
    params = []
    for li in range(7):
        fan_in, fan_out = dims[li], dims[li + 1]
        key, kw, kb = jax.random.split(key, 3)
        bound = 1.0 / jnp.sqrt(fan_in)
        w = jax.random.uniform(kw, (fan_in, fan_out), jnp.float32, -bound, bound)
        b = jax.random.uniform(kb, (1, fan_out), jnp.float32, -bound, bound)
        params.append((w, b))

    bn_params = []
    for li in range(5):
        f = num_features[li]
        key, kg, kb, km, kv = jax.random.split(key, 5)
        gamma = 1.0 + 0.05 * jax.random.normal(kg, (1, f), jnp.float32)
        beta = 0.05 * jax.random.normal(kb, (1, f), jnp.float32)
        rmean = 0.05 * jax.random.normal(km, (1, f), jnp.float32)
        rvar = jnp.abs(1.0 + 0.05 * jax.random.normal(kv, (1, f), jnp.float32))
        bn_params.append((gamma, beta, rmean, rvar))
    return params, bn_params


# --------------------------------------------------------------------------------------
# One-time host-side transform: fold eval-mode BN into the next Linear, pad, pack slabs.
# --------------------------------------------------------------------------------------
def fold_and_pack(params, bn_params, input_size, num_features, num_classes,
                  compute_dtype=jnp.float32):
    n_layers = len(params)            # 7
    n_hidden = n_layers - 1           # 6 layers followed by LeakyReLU
    dims_in = [input_size] + list(num_features)      # fan-in per layer
    dims_out = list(num_features) + [num_classes]    # fan-out per layer

    # Fold BN_l (applied after LeakyReLU of layer l, l = 1..5) into Linear_{l+1}.
    folded = [[w, b] for (w, b) in params]
    for li in range(5):
        g, be, m, v = bn_params[li]                  # [1, f]
        scale = g / jnp.sqrt(v + EPS)                # [1, f]
        shift = be - m * scale                       # [1, f]
        w_next, b_next = folded[li + 1]
        folded[li + 1][0] = w_next * scale.reshape(-1, 1)   # diag(scale) @ W
        folded[li + 1][1] = b_next + shift @ w_next         # b + shift @ W (unscaled W)

    hid_pad = _round_up(max([input_size] + list(num_features)), 128)
    out_pad = _round_up(num_classes, 128)

    wh = jnp.zeros((n_hidden, hid_pad, hid_pad), jnp.float32)
    bh = jnp.zeros((n_hidden, 1, hid_pad), jnp.float32)
    for li in range(n_hidden):
        w, b = folded[li]
        wh = wh.at[li, :dims_in[li], :dims_out[li]].set(w)
        bh = bh.at[li, 0, :dims_out[li]].set(b[0])
    w_out, b_out = folded[n_hidden]
    wo = jnp.zeros((hid_pad, out_pad), jnp.float32).at[:dims_in[-1], :num_classes].set(w_out)
    bo = jnp.zeros((1, out_pad), jnp.float32).at[0, :num_classes].set(b_out[0])

    # Weights may be bf16 (MXU throughput / half the weight bytes on v6e/v7x);
    # biases stay f32 so the VPU epilogue is f32 everywhere (v5e has no bf16 VPU).
    return (wh.astype(compute_dtype), bh, wo.astype(compute_dtype), bo)


# --------------------------------------------------------------------------------------
# Wrapper: pad batch & features, launch grid over batch tiles, slice logits back.
# --------------------------------------------------------------------------------------
@functools.partial(jax.jit, static_argnames=("num_classes", "tb"))
def run_mlp(x, packed, num_classes, tb=128):
    wh, bh, wo, bo = packed
    B, in_dim = x.shape
    hid_pad = wh.shape[1]
    out_pad = wo.shape[1]

    b_pad = _round_up(max(B, tb), tb)
    xp = jnp.zeros((b_pad, hid_pad), jnp.float32).at[:B, :in_dim].set(x)

    grid = (b_pad // tb,)
    out = pl.pallas_call(
        mlp_kernel,
        out_shape=jax.ShapeDtypeStruct((b_pad, out_pad), jnp.float32),
        grid_spec=pltpu.PrefetchScalarGridSpec(
            num_scalar_prefetch=0,
            grid=grid,
            in_specs=[
                pl.BlockSpec((tb, hid_pad), lambda i: (i, 0)),          # activations
                pl.BlockSpec(wh.shape, lambda i: (0, 0, 0)),            # hidden weight slab
                pl.BlockSpec(bh.shape, lambda i: (0, 0, 0)),            # hidden bias slab
                pl.BlockSpec(wo.shape, lambda i: (0, 0)),               # head weight
                pl.BlockSpec(bo.shape, lambda i: (0, 0)),               # head bias
            ],
            out_specs=pl.BlockSpec((tb, out_pad), lambda i: (i, 0)),
        ),
        compiler_params=pltpu.CompilerParams(
            dimension_semantics=("parallel",)),      # megacore shard over batch on v7x
    )(xp, wh, bh, wo, bo)
    return out[:B, :num_classes]


# --------------------------------------------------------------------------------------
# Pure-JAX reference mirroring the PyTorch eval-mode forward (unfolded BN).
# --------------------------------------------------------------------------------------
def reference_forward(x, params, bn_params):
    h = x
    for li in range(5):
        w, b = params[li]
        g, be, m, v = bn_params[li]
        h = h @ w + b
        h = jnp.where(h > 0, h, NEG_SLOPE * h)
        h = (h - m) / jnp.sqrt(v + EPS) * g + be
    w, b = params[5]
    h = h @ w + b
    h = jnp.where(h > 0, h, NEG_SLOPE * h)
    w, b = params[6]
    return h @ w + b


if __name__ == "__main__":
    INPUT_SIZE = 32
    NUM_FEATURES = [64, 64, 64, 64, 64, 64]
    NUM_CLASSES = 138
    BATCH = 256      # batched so the MXU sees a real M dim; tiled into 128-row grid steps

    key = jax.random.PRNGKey(0)
    key, kx = jax.random.split(key)
    x = jax.random.normal(kx, (BATCH, INPUT_SIZE), jnp.float32)

    params, bn_params = init_params(key, INPUT_SIZE, NUM_FEATURES, NUM_CLASSES)
    ref = reference_forward(x, params, bn_params)

    # f32 path (bit-for-bit-ish vs. the unfolded reference)
    packed_f32 = fold_and_pack(params, bn_params, INPUT_SIZE, NUM_FEATURES, NUM_CLASSES,
                               compute_dtype=jnp.float32)
    out = jax.block_until_ready(run_mlp(x, packed_f32, NUM_CLASSES, tb=128))
    assert out.shape == (BATCH, NUM_CLASSES), out.shape
    assert jnp.allclose(out, ref, atol=1e-4, rtol=1e-4), "f32 mismatch vs. reference"

    # bf16-at-MXU path (v6e/v7x throughput lever; elementwise/accumulation stay f32)
    packed_bf16 = fold_and_pack(params, bn_params, INPUT_SIZE, NUM_FEATURES, NUM_CLASSES,
                                compute_dtype=jnp.bfloat16)
    out_bf16 = jax.block_until_ready(run_mlp(x, packed_bf16, NUM_CLASSES, tb=128))
    assert out_bf16.shape == (BATCH, NUM_CLASSES), out_bf16.shape
    assert jnp.allclose(out_bf16, ref, atol=1e-1, rtol=1e-1), "bf16 mismatch vs. reference"

    print("KERNEL_OK")
</pallas_src>

<mosaic_0001>
module attributes {stable_mosaic.version = 11 : i64} {
  func.func @mlp_kernel(%arg0: i32, %arg1: memref<128x128xf32, #tpu.memory_space<vmem>>, %arg2: memref<6x128x128xf32, #tpu.memory_space<vmem>>, %arg3: memref<6x1x128xf32, #tpu.memory_space<vmem>>, %arg4: memref<128x256xf32, #tpu.memory_space<vmem>>, %arg5: memref<1x256xf32, #tpu.memory_space<vmem>>, %arg6: memref<128x256xf32, #tpu.memory_space<vmem>>) attributes {dimension_semantics = [#tpu.dimension_semantics<parallel>], iteration_bounds = array<i64: 2>, scalar_prefetch = 0 : i64, scratch_operands = 0 : i64, tpu.core_type = #tpu.core_type<tc>, window_params = [{transform_indices = @transform_0, window_bounds = array<i64: 128, 128>}, {pipeline_mode = #tpu.pipeline_mode<synchronous>, transform_indices = @transform_1, window_bounds = array<i64: 6, 128, 128>}, {pipeline_mode = #tpu.pipeline_mode<synchronous>, transform_indices = @transform_2, window_bounds = array<i64: 6, 1, 128>}, {pipeline_mode = #tpu.pipeline_mode<synchronous>, transform_indices = @transform_3, window_bounds = array<i64: 128, 256>}, {pipeline_mode = #tpu.pipeline_mode<synchronous>, transform_indices = @transform_4, window_bounds = array<i64: 1, 256>}, {transform_indices = @transform_5, window_bounds = array<i64: 128, 256>}]} {
    %c0 = arith.constant 0 : index
    %c0_0 = arith.constant 0 : index
    %0 = vector.load %arg1[%c0, %c0_0] : memref<128x128xf32, #tpu.memory_space<vmem>>, vector<128x128xf32>
    %c0_1 = arith.constant 0 : index
    %c0_2 = arith.constant 0 : index
    %c0_3 = arith.constant 0 : index
    %1 = vector.load %arg2[%c0_1, %c0_2, %c0_3] : memref<6x128x128xf32, #tpu.memory_space<vmem>>, vector<1x128x128xf32>
    %2 = vector.shape_cast %1 : vector<1x128x128xf32> to vector<128x128xf32>
    %cst = arith.constant dense<0.000000e+00> : vector<128x128xf32>
    %3 = tpu.matmul %0, %2, %cst {dimension_numbers = #tpu.dot_dimension_numbers<[1], [0], [0], [1], [0, 0, 1, 1], [], []>} : vector<128x128xf32>, vector<128x128xf32>, vector<128x128xf32> -> vector<128x128xf32>
    %c0_4 = arith.constant 0 : index
    %c0_5 = arith.constant 0 : index
    %c0_6 = arith.constant 0 : index
    %4 = vector.load %arg3[%c0_4, %c0_5, %c0_6] : memref<6x1x128xf32, #tpu.memory_space<vmem>>, vector<1x1x128xf32>
    %5 = vector.shape_cast %4 : vector<1x1x128xf32> to vector<1x128xf32>
    %6 = vector.broadcast %5 : vector<1x128xf32> to vector<128x128xf32>
    %7 = arith.addf %3, %6 : vector<128x128xf32>
    %cst_7 = arith.constant 0.000000e+00 : f32
    %8 = vector.broadcast %cst_7 : f32 to vector<128x128xf32>
    %9 = arith.cmpf ogt, %7, %8 : vector<128x128xf32>
    %cst_8 = arith.constant 0.00999999977 : f32
    %10 = vector.broadcast %cst_8 : f32 to vector<128x128xf32>
    %11 = arith.mulf %10, %7 : vector<128x128xf32>
    %12 = arith.select %9, %7, %11 : vector<128x128xi1>, vector<128x128xf32>
    %c1 = arith.constant 1 : index
    %c0_9 = arith.constant 0 : index
    %c0_10 = arith.constant 0 : index
    %13 = vector.load %arg2[%c1, %c0_9, %c0_10] : memref<6x128x128xf32, #tpu.memory_space<vmem>>, vector<1x128x128xf32>
    %14 = vector.shape_cast %13 : vector<1x128x128xf32> to vector<128x128xf32>
    %cst_11 = arith.constant dense<0.000000e+00> : vector<128x128xf32>
    %15 = tpu.matmul %12, %14, %cst_11 {dimension_numbers = #tpu.dot_dimension_numbers<[1], [0], [0], [1], [0, 0, 1, 1], [], []>} : vector<128x128xf32>, vector<128x128xf32>, vector<128x128xf32> -> vector<128x128xf32>
    %c1_12 = arith.constant 1 : index
    %c0_13 = arith.constant 0 : index
    %c0_14 = arith.constant 0 : index
    %16 = vector.load %arg3[%c1_12, %c0_13, %c0_14] : memref<6x1x128xf32, #tpu.memory_space<vmem>>, vector<1x1x128xf32>
    %17 = vector.shape_cast %16 : vector<1x1x128xf32> to vector<1x128xf32>
    %18 = vector.broadcast %17 : vector<1x128xf32> to vector<128x128xf32>
    %19 = arith.addf %15, %18 : vector<128x128xf32>
    %cst_15 = arith.constant 0.000000e+00 : f32
    %20 = vector.broadcast %cst_15 : f32 to vector<128x128xf32>
    %21 = arith.cmpf ogt, %19, %20 : vector<128x128xf32>
    %cst_16 = arith.constant 0.00999999977 : f32
    %22 = vector.broadcast %cst_16 : f32 to vector<128x128xf32>
    %23 = arith.mulf %22, %19 : vector<128x128xf32>
    %24 = arith.select %21, %19, %23 : vector<128x128xi1>, vector<128x128xf32>
    %c2 = arith.constant 2 : index
    %c0_17 = arith.constant 0 : index
    %c0_18 = arith.constant 0 : index
    %25 = vector.load %arg2[%c2, %c0_17, %c0_18] : memref<6x128x128xf32, #tpu.memory_space<vmem>>, vector<1x128x128xf32>
    %26 = vector.shape_cast %25 : vector<1x128x128xf32> to vector<128x128xf32>
    %cst_19 = arith.constant dense<0.000000e+00> : vector<128x128xf32>
    %27 = tpu.matmul %24, %26, %cst_19 {dimension_numbers = #tpu.dot_dimension_numbers<[1], [0], [0], [1], [0, 0, 1, 1], [], []>} : vector<128x128xf32>, vector<128x128xf32>, vector<128x128xf32> -> vector<128x128xf32>
    %c2_20 = arith.constant 2 : index
    %c0_21 = arith.constant 0 : index
    %c0_22 = arith.constant 0 : index
    %28 = vector.load %arg3[%c2_20, %c0_21, %c0_22] : memref<6x1x128xf32, #tpu.memory_space<vmem>>, vector<1x1x128xf32>
    %29 = vector.shape_cast %28 : vector<1x1x128xf32> to vector<1x128xf32>
    %30 = vector.broadcast %29 : vector<1x128xf32> to vector<128x128xf32>
    %31 = arith.addf %27, %30 : vector<128x128xf32>
    %cst_23 = arith.constant 0.000000e+00 : f32
    %32 = vector.broadcast %cst_23 : f32 to vector<128x128xf32>
    %33 = arith.cmpf ogt, %31, %32 : vector<128x128xf32>
    %cst_24 = arith.constant 0.00999999977 : f32
    %34 = vector.broadcast %cst_24 : f32 to vector<128x128xf32>
    %35 = arith.mulf %34, %31 : vector<128x128xf32>
    %36 = arith.select %33, %31, %35 : vector<128x128xi1>, vector<128x128xf32>
    %c3 = arith.constant 3 : index
    %c0_25 = arith.constant 0 : index
    %c0_26 = arith.constant 0 : index
    %37 = vector.load %arg2[%c3, %c0_25, %c0_26] : memref<6x128x128xf32, #tpu.memory_space<vmem>>, vector<1x128x128xf32>
    %38 = vector.shape_cast %37 : vector<1x128x128xf32> to vector<128x128xf32>
    %cst_27 = arith.constant dense<0.000000e+00> : vector<128x128xf32>
    %39 = tpu.matmul %36, %38, %cst_27 {dimension_numbers = #tpu.dot_dimension_numbers<[1], [0], [0], [1], [0, 0, 1, 1], [], []>} : vector<128x128xf32>, vector<128x128xf32>, vector<128x128xf32> -> vector<128x128xf32>
    %c3_28 = arith.constant 3 : index
    %c0_29 = arith.constant 0 : index
    %c0_30 = arith.constant 0 : index
    %40 = vector.load %arg3[%c3_28, %c0_29, %c0_30] : memref<6x1x128xf32, #tpu.memory_space<vmem>>, vector<1x1x128xf32>
    %41 = vector.shape_cast %40 : vector<1x1x128xf32> to vector<1x128xf32>
    %42 = vector.broadcast %41 : vector<1x128xf32> to vector<128x128xf32>
    %43 = arith.addf %39, %42 : vector<128x128xf32>
    %cst_31 = arith.constant 0.000000e+00 : f32
    %44 = vector.broadcast %cst_31 : f32 to vector<128x128xf32>
    %45 = arith.cmpf ogt, %43, %44 : vector<128x128xf32>
    %cst_32 = arith.constant 0.00999999977 : f32
    %46 = vector.broadcast %cst_32 : f32 to vector<128x128xf32>
    %47 = arith.mulf %46, %43 : vector<128x128xf32>
    %48 = arith.select %45, %43, %47 : vector<128x128xi1>, vector<128x128xf32>
    %c4 = arith.constant 4 : index
    %c0_33 = arith.constant 0 : index
    %c0_34 = arith.constant 0 : index
    %49 = vector.load %arg2[%c4, %c0_33, %c0_34] : memref<6x128x128xf32, #tpu.memory_space<vmem>>, vector<1x128x128xf32>
    %50 = vector.shape_cast %49 : vector<1x128x128xf32> to vector<128x128xf32>
    %cst_35 = arith.constant dense<0.000000e+00> : vector<128x128xf32>
    %51 = tpu.matmul %48, %50, %cst_35 {dimension_numbers = #tpu.dot_dimension_numbers<[1], [0], [0], [1], [0, 0, 1, 1], [], []>} : vector<128x128xf32>, vector<128x128xf32>, vector<128x128xf32> -> vector<128x128xf32>
    %c4_36 = arith.constant 4 : index
    %c0_37 = arith.constant 0 : index
    %c0_38 = arith.constant 0 : index
    %52 = vector.load %arg3[%c4_36, %c0_37, %c0_38] : memref<6x1x128xf32, #tpu.memory_space<vmem>>, vector<1x1x128xf32>
    %53 = vector.shape_cast %52 : vector<1x1x128xf32> to vector<1x128xf32>
    %54 = vector.broadcast %53 : vector<1x128xf32> to vector<128x128xf32>
    %55 = arith.addf %51, %54 : vector<128x128xf32>
    %cst_39 = arith.constant 0.000000e+00 : f32
    %56 = vector.broadcast %cst_39 : f32 to vector<128x128xf32>
    %57 = arith.cmpf ogt, %55, %56 : vector<128x128xf32>
    %cst_40 = arith.constant 0.00999999977 : f32
    %58 = vector.broadcast %cst_40 : f32 to vector<128x128xf32>
    %59 = arith.mulf %58, %55 : vector<128x128xf32>
    %60 = arith.select %57, %55, %59 : vector<128x128xi1>, vector<128x128xf32>
    %c5 = arith.constant 5 : index
    %c0_41 = arith.constant 0 : index
    %c0_42 = arith.constant 0 : index
    %61 = vector.load %arg2[%c5, %c0_41, %c0_42] : memref<6x128x128xf32, #tpu.memory_space<vmem>>, vector<1x128x128xf32>
    %62 = vector.shape_cast %61 : vector<1x128x128xf32> to vector<128x128xf32>
    %cst_43 = arith.constant dense<0.000000e+00> : vector<128x128xf32>
    %63 = tpu.matmul %60, %62, %cst_43 {dimension_numbers = #tpu.dot_dimension_numbers<[1], [0], [0], [1], [0, 0, 1, 1], [], []>} : vector<128x128xf32>, vector<128x128xf32>, vector<128x128xf32> -> vector<128x128xf32>
    %c5_44 = arith.constant 5 : index
    %c0_45 = arith.constant 0 : index
    %c0_46 = arith.constant 0 : index
    %64 = vector.load %arg3[%c5_44, %c0_45, %c0_46] : memref<6x1x128xf32, #tpu.memory_space<vmem>>, vector<1x1x128xf32>
    %65 = vector.shape_cast %64 : vector<1x1x128xf32> to vector<1x128xf32>
    %66 = vector.broadcast %65 : vector<1x128xf32> to vector<128x128xf32>
    %67 = arith.addf %63, %66 : vector<128x128xf32>
    %cst_47 = arith.constant 0.000000e+00 : f32
    %68 = vector.broadcast %cst_47 : f32 to vector<128x128xf32>
    %69 = arith.cmpf ogt, %67, %68 : vector<128x128xf32>
    %cst_48 = arith.constant 0.00999999977 : f32
    %70 = vector.broadcast %cst_48 : f32 to vector<128x128xf32>
    %71 = arith.mulf %70, %67 : vector<128x128xf32>
    %72 = arith.select %69, %67, %71 : vector<128x128xi1>, vector<128x128xf32>
    %c0_49 = arith.constant 0 : index
    %c0_50 = arith.constant 0 : index
    %73 = vector.load %arg4[%c0_49, %c0_50] : memref<128x256xf32, #tpu.memory_space<vmem>>, vector<128x256xf32>
    %cst_51 = arith.constant dense<0.000000e+00> : vector<128x256xf32>
    %74 = tpu.matmul %72, %73, %cst_51 {dimension_numbers = #tpu.dot_dimension_numbers<[1], [0], [0], [1], [0, 0, 1, 1], [], []>} : vector<128x128xf32>, vector<128x256xf32>, vector<128x256xf32> -> vector<128x256xf32>
    %c0_52 = arith.constant 0 : index
    %c0_53 = arith.constant 0 : index
    %75 = vector.load %arg5[%c0_52, %c0_53] : memref<1x256xf32, #tpu.memory_space<vmem>>, vector<1x256xf32>
    %76 = vector.broadcast %75 : vector<1x256xf32> to vector<128x256xf32>
    %77 = arith.addf %74, %76 : vector<128x256xf32>
    %c0_54 = arith.constant 0 : index
    %c0_55 = arith.constant 0 : index
    %78 = vector.load %arg6[%c0_54, %c0_55] : memref<128x256xf32, #tpu.memory_space<vmem>>, vector<128x256xf32>
    tpu.vector_store %arg6[%c0_54, %c0_55], %77 {strides = array<i32>} : memref<128x256xf32, #tpu.memory_space<vmem>>, vector<128x256xf32>,
    return
  }
  func.func @transform_0(%arg0: i32) -> (i32, i32) {
    %c0_i32 = arith.constant 0 : i32
    %c0_i32_0 = arith.constant 0 : i32
    return %arg0, %c0_i32 : i32, i32
  }
  func.func @transform_1(%arg0: i32) -> (i32, i32, i32) {
    %c0_i32 = arith.constant 0 : i32
    %c0_i32_0 = arith.constant 0 : i32
    %c0_i32_1 = arith.constant 0 : i32
    %c0_i32_2 = arith.constant 0 : i32
    return %c0_i32, %c0_i32_0, %c0_i32_1 : i32, i32, i32
  }
  func.func @transform_2(%arg0: i32) -> (i32, i32, i32) {
    %c0_i32 = arith.constant 0 : i32
    %c0_i32_0 = arith.constant 0 : i32
    %c0_i32_1 = arith.constant 0 : i32
    %c0_i32_2 = arith.constant 0 : i32
    return %c0_i32, %c0_i32_0, %c0_i32_1 : i32, i32, i32
  }
  func.func @transform_3(%arg0: i32) -> (i32, i32) {
    %c0_i32 = arith.constant 0 : i32
    %c0_i32_0 = arith.constant 0 : i32
    %c0_i32_1 = arith.constant 0 : i32
    return %c0_i32, %c0_i32_0 : i32, i32
  }
  func.func @transform_4(%arg0: i32) -> (i32, i32) {
    %c0_i32 = arith.constant 0 : i32
    %c0_i32_0 = arith.constant 0 : i32
    %c0_i32_1 = arith.constant 0 : i32
    return %c0_i32, %c0_i32_0 : i32, i32
  }
  func.func @transform_5(%arg0: i32) -> (i32, i32) {
    %c0_i32 = arith.constant 0 : i32
    %c0_i32_0 = arith.constant 0 : i32
    return %arg0, %c0_i32 : i32, i32
  }
}

</mosaic_0001>

<bundles_post_ra>
// kernel: run_mlp.1
= control target key start
LH: loop header
LB: loop body
LE: loop exit
PB: predicated region body
PF: predicated region fallthrough
CT: control target
= control target key end

     0   :  { %s2527_s18 = smov 0   ;;  %s3165_s0 = inlined_call_operand.vmem [shape: f32[256,128], index: 0, kind: input, shape index: {}]   ;;  %s3166_s1 = inlined_call_operand.vmem [shape: f32[6,128,128], index: 1, kind: input, shape index: {}]   ;;  %s3167_s2 = inlined_call_operand.vmem [shape: f32[6,1,128], index: 2, kind: input, shape index: {}]   ;;  %s3168_s3 = inlined_call_operand.vmem [shape: f32[128,256], index: 3, kind: input, shape index: {}]   ;;  %s3169_s4 = inlined_call_operand.vmem [shape: f32[1,256], index: 4, kind: input, shape index: {}]   ;;  %s3170_s5 = inlined_call_operand.vmem [shape: f32[256,256], index: 5, kind: output, shape index: {}]  }
   0x1 LB: > { %s1847_s19 = sadd.s32 4294967295, %s2494_s18   ;;  %p1851_p0 = scmp.ge.s32.totalorder %s2494_s18, 1  ;;  %s2494_s18 = sphi %s2527_s18, %s15_s18  }
   0x2   : > { %p188_p1 = scmp.lt.s32.totalorder %s2494_s18, 3 }
   0x4   : > { %p189_p2 = pnand %p1851_p0, %p188_p1 }
   0x5   : > { %s1852_s24 = sshll.u32 (!%p189_p2), %s1847_s19, 4 }
   0x6   : > { %192 = sbr.rel (%p189_p2) target bundleno = 1507 (0x5e3), region = 40  ;;  %p218_p3 = scmp.lt.s32.totalorder (!%p189_p2), %s1852_s24, 31 }
   0xb   : > { %v261_v0 = vld [vmem:[%s3166_s1 + $0x78] sm:$0xff]  ;;  %v260_v1 = vld [vmem:[%s3166_s1 + $0x70] sm:$0xff]  ;;  %v259_v2 = vld [vmem:[%s3166_s1 + $0x68] sm:$0xff]  ;;  %s3172_s24 = smov (!%p218_p3, %s1852_s24), 31 }
   0xc   : > { %2143 = vmatprep.subr.mxu1 %v261_v0  ;;  %v258_v3 = vld [vmem:[%s3166_s1 + $0x60] sm:$0xff]  ;;  %s1853_s29 = sshll.u32 %s3172_s24, 3  ;;  %v257_v4 = vld [vmem:[%s3166_s1 + $0x58] sm:$0xff]  ;;  %v256_v6 = vld [vmem:[%s3166_s1 + $0x50] sm:$0xff]  ;;  %s1950_s19 = sshll.u32 %s3172_s24, 4 }
   0xd   : > { %2144 = vmatpush3.msra.mxu1 %v261_v0  ;;  %s2556_s9 = scalar_lea.vmem %s3165_s0, %s1853_s29  ;;  %v255_v7 = vld [vmem:[%s3166_s1 + $0x48] sm:$0xff]  ;;  %v254_v8 = vld [vmem:[%s3166_s1 + $0x40] sm:$0xff]  ;;  %v253_v9 = vld [vmem:[%s3166_s1 + $0x38] sm:$0xff]  ;;  %s3096_s22 = scalar_lea.vmem %s3170_s5, %s1950_s19 }
   0xe   : > { %2145 = vmatprep.subr.mxu1 %v260_v1  ;;  %v230_v5 = vld [vmem:[%s2556_s9] sm:$0xff]  ;;  %v252_v10 = vld [vmem:[%s3166_s1 + $0x30] sm:$0xff]  ;;  %v251_v11 = vld [vmem:[%s3166_s1 + $0x28] sm:$0xff] }
   0xf   : > { %2146 = vmatpush3.msra.mxu1 %v260_v1  ;;  %2175 = vmatprep.mubr.f32.mxu1 %v230_v5  ;;  %v250_v12 = vld [vmem:[%s3166_s1 + $0x20] sm:$0xff]  ;;  %v249_v13 = vld [vmem:[%s3166_s1 + $0x18] sm:$0xff]  ;;  %v248_v14 = vld [vmem:[%s3166_s1 + $0x10] sm:$0xff] }
  0x10   : > { %2147 = vmatprep.subr.mxu1 %v259_v2  ;;  %v247_v15 = vld [vmem:[%s3166_s1 + $0x8] sm:$0xff]  ;;  %v246_v16 = vld [vmem:[%s3166_s1] sm:$0xff]  ;;  %v1873_v18 = vld [vmem:[%s3166_s1 + $0xf8] sm:$0xff] }
  0x11   : > { %2148 = vmatpush3.msra.mxu1 %v259_v2  ;;  %v231_v17 = vld [vmem:[%s2556_s9 + $0x8] sm:$0xff]  ;;  %v232_v19 = vld [vmem:[%s2556_s9 + $0x10] sm:$0xff]  ;;  %v233_v21 = vld [vmem:[%s2556_s9 + $0x18] sm:$0xff] }
  0x12   : > { %2149 = vmatprep.subr.mxu1 %v258_v3  ;;  %v1872_v20 = vld [vmem:[%s3166_s1 + $0xf0] sm:$0xff]  ;;  %v1871_v22 = vld [vmem:[%s3166_s1 + $0xe8] sm:$0xff]  ;;  %v234_v23 = vld [vmem:[%s2556_s9 + $0x20] sm:$0xff] }
  0x13   : > { %2150 = vmatpush3.msra.mxu1 %v258_v3  ;;  %v1870_v24 = vld [vmem:[%s3166_s1 + $0xe0] sm:$0xff]  ;;  %v235_v25 = vld [vmem:[%s2556_s9 + $0x28] sm:$0xff]  ;;  %v1869_v26 = vld [vmem:[%s3166_s1 + $0xd8] sm:$0xff] }
  0x14   : > { %2151 = vmatprep.subr.mxu1 %v257_v4  ;;  %v236_v27 = vld [vmem:[%s2556_s9 + $0x30] sm:$0xff]  ;;  %v237_v29 = vld [vmem:[%s2556_s9 + $0x38] sm:$0xff]  ;;  %v1867_v30 = vld [vmem:[%s3166_s1 + $0xc8] sm:$0xff] }
  0x15   : > { %2152 = vmatpush3.msra.mxu1 %v257_v4  ;;  %v1868_v28 = vld [vmem:[%s3166_s1 + $0xd0] sm:$0xff]  ;;  %v238_v31 = vld [vmem:[%s2556_s9 + $0x40] sm:$0xff]  ;;  %v239_v33 = vld [vmem:[%s2556_s9 + $0x48] sm:$0xff] }
  0x16   : > { %2153 = vmatprep.subr.mxu1 %v256_v6  ;;  %v1866_v32 = vld [vmem:[%s3166_s1 + $0xc0] sm:$0xff]  ;;  %v1865_v34 = vld [vmem:[%s3166_s1 + $0xb8] sm:$0xff]  ;;  %v240_v35 = vld [vmem:[%s2556_s9 + $0x50] sm:$0xff] }
  0x17   : > { %2154 = vmatpush3.msra.mxu1 %v256_v6  ;;  %v1864_v36 = vld [vmem:[%s3166_s1 + $0xb0] sm:$0xff]  ;;  %v241_v37 = vld [vmem:[%s2556_s9 + $0x58] sm:$0xff]  ;;  %v1863_v38 = vld [vmem:[%s3166_s1 + $0xa8] sm:$0xff] }
  0x18   : > { %2155 = vmatprep.subr.mxu1 %v255_v7  ;;  %v242_v39 = vld [vmem:[%s2556_s9 + $0x60] sm:$0xff]  ;;  %v243_v41 = vld [vmem:[%s2556_s9 + $0x68] sm:$0xff]  ;;  %v244_v42 = vld [vmem:[%s2556_s9 + $0x70] sm:$0xff] }
  0x19   : > { %2156 = vmatpush3.msra.mxu1 %v255_v7  ;;  %v1862_v40 = vld [vmem:[%s3166_s1 + $0xa0] sm:$0xff]  ;;  %v245_v43 = vld [vmem:[%s2556_s9 + $0x78] sm:$0xff]  ;;  %v1860_v45 = vld [vmem:[%s3166_s1 + $0x90] sm:$0xff] }
  0x1a   : > { %2157 = vmatprep.subr.mxu1 %v254_v8  ;;  %v1861_v44 = vld [vmem:[%s3166_s1 + $0x98] sm:$0xff]  ;;  %v1859_v46 = vld [vmem:[%s3166_s1 + $0x88] sm:$0xff]  ;;  %v1858_v47 = vld [vmem:[%s3166_s1 + $0x80] sm:$0xff] }
  0x1b   : > { %2158 = vmatpush3.msra.mxu1 %v254_v8  ;;  %v1891_v48 = vld [vmem:[%s3166_s1 + $0x178] sm:$0xff]  ;;  %v1890_v49 = vld [vmem:[%s3166_s1 + $0x170] sm:$0xff]  ;;  %v1889_v50 = vld [vmem:[%s3166_s1 + $0x168] sm:$0xff] }
  0x1c   : > { %2159 = vmatprep.subr.mxu1 %v253_v9  ;;  %2255 = vmatprep.subr.mxu0 %v1891_v48  ;;  %v1888_v51 = vld [vmem:[%s3166_s1 + $0x160] sm:$0xff]  ;;  %v1887_v52 = vld [vmem:[%s3166_s1 + $0x158] sm:$0xff]  ;;  %v1886_v53 = vld [vmem:[%s3166_s1 + $0x150] sm:$0xff] }
  0x1d   : > { %2160 = vmatpush3.msra.mxu1 %v253_v9  ;;  %2256 = vmatpush3.msra.mxu0 %v1891_v48  ;;  %v1885_v54 = vld [vmem:[%s3166_s1 + $0x148] sm:$0xff]  ;;  %v1884_v55 = vld [vmem:[%s3166_s1 + $0x140] sm:$0xff]  ;;  %v1883_v56 = vld [vmem:[%s3166_s1 + $0x138] sm:$0xff] }
  0x1e   : > { %2161 = vmatprep.subr.mxu1 %v252_v10  ;;  %2257 = vmatprep.subr.mxu0 %v1890_v49  ;;  %v1882_v57 = vld [vmem:[%s3166_s1 + $0x130] sm:$0xff]  ;;  %v1881_v58 = vld [vmem:[%s3166_s1 + $0x128] sm:$0xff]  ;;  %v1880_v59 = vld [vmem:[%s3166_s1 + $0x120] sm:$0xff] }
  0x1f   : > { %2162 = vmatpush3.msra.mxu1 %v252_v10  ;;  %2258 = vmatpush3.msra.mxu0 %v1890_v49  ;;  %v2694_v60 = vld [vmem:[%s3167_s2] ss:$0 sm:$0xff] }
  0x20   : > { %2163 = vmatprep.subr.mxu1 %v251_v11  ;;  %2259 = vmatprep.subr.mxu0 %v1889_v50 }
  0x21   : > { %2164 = vmatpush3.msra.mxu1 %v251_v11  ;;  %2260 = vmatpush3.msra.mxu0 %v1889_v50 }
  0x22   : > { %2165 = vmatprep.subr.mxu1 %v250_v12  ;;  %2261 = vmatprep.subr.mxu0 %v1888_v51 }
  0x23   : > { %2166 = vmatpush3.msra.mxu1 %v250_v12  ;;  %2262 = vmatpush3.msra.mxu0 %v1888_v51 }
  0x24   : > { %2167 = vmatprep.subr.mxu1 %v249_v13  ;;  %2263 = vmatprep.subr.mxu0 %v1887_v52 }
  0x25   : > { %2168 = vmatpush3.msra.mxu1 %v249_v13  ;;  %2264 = vmatpush3.msra.mxu0 %v1887_v52 }
  0x26   : > { %2169 = vmatprep.subr.mxu1 %v248_v14  ;;  %2265 = vmatprep.subr.mxu0 %v1886_v53 }
  0x27   : > { %2170 = vmatpush3.msra.mxu1 %v248_v14  ;;  %2266 = vmatpush3.msra.mxu0 %v1886_v53 }
  0x28   : > { %2171 = vmatprep.subr.mxu1 %v247_v15  ;;  %2267 = vmatprep.subr.mxu0 %v1885_v54 }
  0x29   : > { %2172 = vmatpush3.msra.mxu1 %v247_v15  ;;  %2268 = vmatpush3.msra.mxu0 %v1885_v54 }
  0x2a   : > { %2173 = vmatprep.subr.mxu1 %v246_v16  ;;  %2269 = vmatprep.subr.mxu0 %v1884_v55 }
  0x2b   : > { %2174 = vmatpush3.msra.mxu1 %v246_v16  ;;  %2270 = vmatpush3.msra.mxu0 %v1884_v55 }
  0x2c   : > { %2176 = vmatmul.mubr.f32.vlgmr.msra.gmra.mxu1 %v231_v17  ;;  %2199 = vmatprep.subr.mxu1 %v1873_v18 }
  0x2d   : > { %2178 = vmatprep.mubr.f32.mxu1 %v232_v19  ;;  %2200 = vmatpush3.msra.mxu1 %v1873_v18 }
  0x2e   : > { %2201 = vmatprep.subr.mxu1 %v1872_v20  ;;  %2271 = vmatprep.subr.mxu0 %v1883_v56 }
  0x2f   : > { %2202 = vmatpush3.msra.mxu1 %v1872_v20  ;;  %2272 = vmatpush3.msra.mxu0 %v1883_v56 }
  0x30   : > { %2179 = vmatmul.mubr.f32.gmra.mxu1 %v233_v21  ;;  %2203 = vmatprep.subr.mxu1 %v1871_v22 }
  0x31   : > { %2181 = vmatprep.mubr.f32.mxu1 %v234_v23  ;;  %2204 = vmatpush3.msra.mxu1 %v1871_v22 }
  0x32   : > { %2205 = vmatprep.subr.mxu1 %v1870_v24  ;;  %2273 = vmatprep.subr.mxu0 %v1882_v57 }
  0x33   : > { %2206 = vmatpush3.msra.mxu1 %v1870_v24  ;;  %2274 = vmatpush3.msra.mxu0 %v1882_v57 }
  0x34   : > { %2182 = vmatmul.mubr.f32.gmra.mxu1 %v235_v25  ;;  %2207 = vmatprep.subr.mxu1 %v1869_v26 }
  0x35   : > { %2184 = vmatprep.mubr.f32.mxu1 %v236_v27  ;;  %2208 = vmatpush3.msra.mxu1 %v1869_v26 }
  0x36   : > { %2209 = vmatprep.subr.mxu1 %v1868_v28  ;;  %2275 = vmatprep.subr.mxu0 %v1881_v58 }
  0x37   : > { %2210 = vmatpush3.msra.mxu1 %v1868_v28  ;;  %2276 = vmatpush3.msra.mxu0 %v1881_v58 }
  0x38   : > { %2185 = vmatmul.mubr.f32.gmra.mxu1 %v237_v29  ;;  %2211 = vmatprep.subr.mxu1 %v1867_v30 }
  0x39   : > { %2187 = vmatprep.mubr.f32.mxu1 %v238_v31  ;;  %2212 = vmatpush3.msra.mxu1 %v1867_v30 }
  0x3a   : > { %2213 = vmatprep.subr.mxu1 %v1866_v32  ;;  %2277 = vmatprep.subr.mxu0 %v1880_v59 }
  0x3b   : > { %2214 = vmatpush3.msra.mxu1 %v1866_v32  ;;  %2278 = vmatpush3.msra.mxu0 %v1880_v59 }
  0x3c   : > { %2188 = vmatmul.mubr.f32.gmra.mxu1 %v239_v33  ;;  %2215 = vmatprep.subr.mxu1 %v1865_v34 }
  0x3d   : > { %2190 = vmatprep.mubr.f32.mxu1 %v240_v35  ;;  %2216 = vmatpush3.msra.mxu1 %v1865_v34 }
  0x3e   : > { %2217 = vmatprep.subr.mxu1 %v1864_v36 }
  0x3f   : > { %2218 = vmatpush3.msra.mxu1 %v1864_v36 }
  0x40   : > { %2191 = vmatmul.mubr.f32.gmra.mxu1 %v241_v37  ;;  %2219 = vmatprep.subr.mxu1 %v1863_v38 }
  0x41   : > { %2193 = vmatprep.mubr.f32.mxu1 %v242_v39  ;;  %2220 = vmatpush3.msra.mxu1 %v1863_v38 }
  0x42   : > { %2221 = vmatprep.subr.mxu1 %v1862_v40 }
  0x43   : > { %2222 = vmatpush3.msra.mxu1 %v1862_v40 }
  0x44   : > { %2194 = vmatmul.mubr.f32.gmra.mxu1 %v243_v41  ;;  %2223 = vmatprep.subr.mxu1 %v1861_v44 }
  0x45   : > { %2196 = vmatprep.mubr.f32.mxu1 %v244_v42  ;;  %2224 = vmatpush3.msra.mxu1 %v1861_v44 }
  0x46   : > { %2225 = vmatprep.subr.mxu1 %v1860_v45 }
  0x47   : > { %2226 = vmatpush3.msra.mxu1 %v1860_v45 }
  0x48   : > { %2197 = vmatmul.mubr.f32.gmra.mxu1 %v245_v43  ;;  %2227 = vmatprep.subr.mxu1 %v1859_v46 }
  0x49   : > { %2228 = vmatpush3.msra.mxu1 %v1859_v46 }
  0x4a   : > { %2229 = vmatprep.subr.mxu1 %v1858_v47 }
  0x4b   : > { %2230 = vmatpush3.msra.mxu1 %v1858_v47 }
  0xec   : > { %v2177_v61 = vpop.f32.mrf.mxu1 }
  0xed   : > { %v341_v62 = vadd.f32 %v2177_v61, %v2694_v60 }
  0xee   : > { %v335_v63 = vpop.f32.mrf.mxu1 }
  0xef   : > { %v336_v0 = vadd.f32 %v2694_v60, %v335_v63  ;;  %v431_v1 = vmul.f32 0.01, %v341_v62  ;;  %vm415_vm0 = vcmp.gt.f32.partialorder %v341_v62, 0.0  ;;  %v1877_v63 = vld [vmem:[%s3166_s1 + $0x108] sm:$0xff] }
  0xf0   : > { %v2180_v2 = vpop.f32.mrf.mxu1 }
  0xf1   : > { %v430_v3 = vmul.f32 0.01, %v336_v0  ;;  %v351_v4 = vadd.f32 %v2180_v2, %v2694_v60  ;;  %vm414_vm1 = vcmp.gt.f32.partialorder %v336_v0, 0.0  ;;  %v447_v9 = vsel %vm415_vm0, %v341_v62, %v431_v1  ;;  %v1879_v62 = vld [vmem:[%s3166_s1 + $0x118] sm:$0xff]  ;;  %v1908_v2 = vld [vmem:[%s3166_s1 + $0x1f0] sm:$0xff] }
  0xf2   : > { %v345_v5 = vpop.f32.mrf.mxu1  ;;  %2279 = vmatprep.subr.mxu0 %v1879_v62  ;;  %v1909_v1 = vld [vmem:[%s3166_s1 + $0x1f8] sm:$0xff] }
  0xf3   : > { %v433_v6 = vmul.f32 0.01, %v351_v4  ;;  %v346_v7 = vadd.f32 %v2694_v60, %v345_v5  ;;  %v446_v8 = vsel %vm414_vm1, %v336_v0, %v430_v3  ;;  %vm417_vm2 = vcmp.gt.f32.partialorder %v351_v4, 0.0  ;;  %2280 = vmatpush3.msra.mxu0 %v1879_v62  ;;  %v1876_v0 = vld [vmem:[%s3166_s1 + $0x100] sm:$0xff]  ;;  %2311 = vmatprep.subr.mxu1 %v1909_v1  ;;  %v1907_v3 = vld [vmem:[%s3166_s1 + $0x1e8] sm:$0xff]  ;;  %v1905_v5 = vld [vmem:[%s3166_s1 + $0x1d8] sm:$0xff] }
  0xf4   : > { %v2183_v10 = vpop.f32.mrf.mxu1  ;;  %2231 = vmatprep.mubr.f32.mxu1 %v446_v8  ;;  %v1902_v8 = vld [vmem:[%s3166_s1 + $0x1c0] sm:$0xff] }
  0xf5   : > { %v432_v11 = vmul.f32 0.01, %v346_v7  ;;  %v361_v12 = vadd.f32 %v2183_v10, %v2694_v60  ;;  %2232 = vmatmul.mubr.f32.vlgmr.msra.gmra.mxu1 %v447_v9  ;;  %vm416_vm3 = vcmp.gt.f32.partialorder %v346_v7, 0.0  ;;  %v449_v14 = vsel %vm417_vm2, %v351_v4, %v433_v6  ;;  %v1906_v4 = vld [vmem:[%s3166_s1 + $0x1e0] sm:$0xff]  ;;  %v1904_v6 = vld [vmem:[%s3166_s1 + $0x1d0] sm:$0xff]  ;;  %v1901_v9 = vld [vmem:[%s3166_s1 + $0x1b8] sm:$0xff] }
  0xf6   : > { %v355_v13 = vpop.f32.mrf.mxu1  ;;  %2312 = vmatpush3.msra.mxu1 %v1909_v1  ;;  %v1900_v10 = vld [vmem:[%s3166_s1 + $0x1b0] sm:$0xff] }
  0xf7   : > { %v435_v15 = vmul.f32 0.01, %v361_v12  ;;  %v356_v16 = vadd.f32 %v2694_v60, %v355_v13  ;;  %v448_v17 = vsel %vm416_vm3, %v346_v7, %v432_v11  ;;  %vm419_vm4 = vcmp.gt.f32.partialorder %v361_v12, 0.0  ;;  %2313 = vmatprep.subr.mxu1 %v1908_v2  ;;  %v1903_v7 = vld [vmem:[%s3166_s1 + $0x1c8] sm:$0xff]  ;;  %v2763_v13 = vld [vmem:[%s3167_s2 + $0x1] ss:$0 sm:$0xff] }
  0xf8   : > { %v2186_v18 = vpop.f32.mrf.mxu1  ;;  %2234 = vmatprep.mubr.f32.mxu1 %v448_v17  ;;  %2314 = vmatpush3.msra.mxu1 %v1908_v2  ;;  %v1899_v11 = vld [vmem:[%s3166_s1 + $0x1a8] sm:$0xff] }
  0xf9   : > { %v434_v19 = vmul.f32 0.01, %v356_v16  ;;  %v371_v20 = vadd.f32 %v2186_v18, %v2694_v60  ;;  %2235 = vmatmul.mubr.f32.gmra.mxu1 %v449_v14  ;;  %vm418_vm5 = vcmp.gt.f32.partialorder %v356_v16, 0.0  ;;  %v451_v22 = vsel %vm419_vm4, %v361_v12, %v435_v15  ;;  %2315 = vmatprep.subr.mxu1 %v1907_v3  ;;  %v1898_v12 = vld [vmem:[%s3166_s1 + $0x1a0] sm:$0xff] }
  0xfa   : > { %v365_v21 = vpop.f32.mrf.mxu1  ;;  %2316 = vmatpush3.msra.mxu1 %v1907_v3 }
  0xfb   : > { %v437_v23 = vmul.f32 0.01, %v371_v20  ;;  %v366_v24 = vadd.f32 %v2694_v60, %v365_v21  ;;  %v450_v25 = vsel %vm418_vm5, %v356_v16, %v434_v19  ;;  %vm421_vm6 = vcmp.gt.f32.partialorder %v371_v20, 0.0  ;;  %2317 = vmatprep.subr.mxu1 %v1906_v4 }
  0xfc   : > { %v2189_v26 = vpop.f32.mrf.mxu1  ;;  %2237 = vmatprep.mubr.f32.mxu1 %v450_v25  ;;  %2318 = vmatpush3.msra.mxu1 %v1906_v4 }
  0xfd   : > { %v436_v27 = vmul.f32 0.01, %v366_v24  ;;  %v381_v28 = vadd.f32 %v2189_v26, %v2694_v60  ;;  %2238 = vmatmul.mubr.f32.gmra.mxu1 %v451_v22  ;;  %vm420_vm7 = vcmp.gt.f32.partialorder %v366_v24, 0.0  ;;  %v453_v30 = vsel %vm421_vm6, %v371_v20, %v437_v23  ;;  %2319 = vmatprep.subr.mxu1 %v1905_v5 }
  0xfe   : > { %v375_v29 = vpop.f32.mrf.mxu1  ;;  %2320 = vmatpush3.msra.mxu1 %v1905_v5 }
  0xff   : > { %v439_v31 = vmul.f32 0.01, %v381_v28  ;;  %v376_v32 = vadd.f32 %v2694_v60, %v375_v29  ;;  %v452_v33 = vsel %vm420_vm7, %v366_v24, %v436_v27  ;;  %vm423_vm8 = vcmp.gt.f32.partialorder %v381_v28, 0.0  ;;  %2321 = vmatprep.subr.mxu1 %v1904_v6 }
 0x100   : > { %v2192_v34 = vpop.f32.mrf.mxu1  ;;  %2240 = vmatprep.mubr.f32.mxu1 %v452_v33  ;;  %2322 = vmatpush3.msra.mxu1 %v1904_v6 }
 0x101   : > { %v438_v35 = vmul.f32 0.01, %v376_v32  ;;  %v391_v36 = vadd.f32 %v2192_v34, %v2694_v60  ;;  %2241 = vmatmul.mubr.f32.gmra.mxu1 %v453_v30  ;;  %vm422_vm9 = vcmp.gt.f32.partialorder %v376_v32, 0.0  ;;  %v455_v38 = vsel %vm423_vm8, %v381_v28, %v439_v31  ;;  %2323 = vmatprep.subr.mxu1 %v1903_v7 }
 0x102   : > { %v385_v37 = vpop.f32.mrf.mxu1  ;;  %2324 = vmatpush3.msra.mxu1 %v1903_v7 }
 0x103   : > { %v441_v39 = vmul.f32 0.01, %v391_v36  ;;  %v386_v40 = vadd.f32 %v2694_v60, %v385_v37  ;;  %v454_v41 = vsel %vm422_vm9, %v376_v32, %v438_v35  ;;  %vm425_vm10 = vcmp.gt.f32.partialorder %v391_v36, 0.0  ;;  %2325 = vmatprep.subr.mxu1 %v1902_v8 }
 0x104   : > { %v2195_v42 = vpop.f32.mrf.mxu1  ;;  %2243 = vmatprep.mubr.f32.mxu1 %v454_v41  ;;  %2326 = vmatpush3.msra.mxu1 %v1902_v8 }
 0x105   : > { %v440_v43 = vmul.f32 0.01, %v386_v40  ;;  %v401_v44 = vadd.f32 %v2195_v42, %v2694_v60  ;;  %2244 = vmatmul.mubr.f32.gmra.mxu1 %v455_v38  ;;  %vm424_vm11 = vcmp.gt.f32.partialorder %v386_v40, 0.0  ;;  %v457_v46 = vsel %vm425_vm10, %v391_v36, %v441_v39  ;;  %2327 = vmatprep.subr.mxu1 %v1901_v9 }
 0x106   : > { %v395_v45 = vpop.f32.mrf.mxu1  ;;  %2328 = vmatpush3.msra.mxu1 %v1901_v9 }
 0x107   : > { %v443_v47 = vmul.f32 0.01, %v401_v44  ;;  %v396_v48 = vadd.f32 %v2694_v60, %v395_v45  ;;  %v456_v49 = vsel %vm424_vm11, %v386_v40, %v440_v43  ;;  %vm427_vm12 = vcmp.gt.f32.partialorder %v401_v44, 0.0  ;;  %2329 = vmatprep.subr.mxu1 %v1900_v10 }
 0x108   : > { %v2198_v50 = vpop.f32.mrf.mxu1  ;;  %2246 = vmatprep.mubr.f32.mxu1 %v456_v49  ;;  %2330 = vmatpush3.msra.mxu1 %v1900_v10 }
 0x109   : > { %v442_v51 = vmul.f32 0.01, %v396_v48  ;;  %v411_v52 = vadd.f32 %v2198_v50, %v2694_v60  ;;  %2247 = vmatmul.mubr.f32.gmra.mxu1 %v457_v46  ;;  %vm426_vm13 = vcmp.gt.f32.partialorder %v396_v48, 0.0  ;;  %v459_v54 = vsel %vm427_vm12, %v401_v44, %v443_v47  ;;  %2331 = vmatprep.subr.mxu1 %v1899_v11 }
 0x10a   : > { %v405_v53 = vpop.f32.mrf.mxu1  ;;  %2332 = vmatpush3.msra.mxu1 %v1899_v11 }
 0x10b   : > { %v445_v55 = vmul.f32 0.01, %v411_v52  ;;  %v406_v56 = vadd.f32 %v2694_v60, %v405_v53  ;;  %v458_v57 = vsel %vm426_vm13, %v396_v48, %v442_v51  ;;  %vm429_vm14 = vcmp.gt.f32.partialorder %v411_v52, 0.0  ;;  %v1878_v60 = vld [vmem:[%s3166_s1 + $0x110] sm:$0xff]  ;;  %2333 = vmatprep.subr.mxu1 %v1898_v12 }
 0x10c   : > { %2249 = vmatprep.mubr.f32.mxu1 %v458_v57  ;;  %2281 = vmatprep.subr.mxu0 %v1878_v60 }
 0x10d   : > { %v444_v58 = vmul.f32 0.01, %v406_v56  ;;  %2250 = vmatmul.mubr.f32.gmra.mxu1 %v459_v54  ;;  %vm428_vm15 = vcmp.gt.f32.partialorder %v406_v56, 0.0  ;;  %v461_v59 = vsel %vm429_vm14, %v411_v52, %v445_v55  ;;  %2282 = vmatpush3.msra.mxu0 %v1878_v60 }
 0x10e   : > { %2283 = vmatprep.subr.mxu0 %v1877_v63  ;;  %2334 = vmatpush3.msra.mxu1 %v1898_v12 }
 0x10f   : > { %v460_v61 = vsel %vm428_vm15, %v406_v56, %v444_v58  ;;  %2284 = vmatpush3.msra.mxu0 %v1877_v63 }
 0x110   : > { %2252 = vmatprep.mubr.f32.mxu1 %v460_v61  ;;  %2285 = vmatprep.subr.mxu0 %v1876_v0 }
 0x111   : > { %2253 = vmatmul.mubr.f32.gmra.mxu1 %v461_v59  ;;  %2286 = vmatpush3.msra.mxu0 %v1876_v0 }
 0x1b5   : > { %v2233_v14 = vpop.f32.mrf.mxu1 }
 0x1b6   : > { %v559_v15 = vadd.f32 %v2233_v14, %v2763_v13 }
 0x1b7   : > { %v553_v16 = vpop.f32.mrf.mxu1 }
 0x1b8   : > { %v554_v17 = vadd.f32 %v2763_v13, %v553_v16  ;;  %v649_v18 = vmul.f32 0.01, %v559_v15  ;;  %vm633_vm1 = vcmp.gt.f32.partialorder %v559_v15, 0.0  ;;  %v1895_v16 = vld [vmem:[%s3166_s1 + $0x188] sm:$0xff] }
 0x1b9   : > { %v2236_v19 = vpop.f32.mrf.mxu1 }
 0x1ba   : > { %v569_v20 = vadd.f32 %v2236_v19, %v2763_v13  ;;  %vm632_vm0 = vcmp.gt.f32.partialorder %v554_v17, 0.0  ;;  %v648_v21 = vmul.f32 0.01, %v554_v17  ;;  %v665_v27 = vsel %vm633_vm1, %v559_v15, %v649_v18  ;;  %v1897_v15 = vld [vmem:[%s3166_s1 + $0x198] sm:$0xff]  ;;  %v1926_v19 = vld [vmem:[%s3166_s1 + $0x270] sm:$0xff] }
 0x1bb   : > { %v563_v22 = vpop.f32.mrf.mxu1  ;;  %2335 = vmatprep.subr.mxu1 %v1897_v15  ;;  %v1927_v18 = vld [vmem:[%s3166_s1 + $0x278] sm:$0xff] }
 0x1bc   : > { %v564_v23 = vadd.f32 %v2763_v13, %v563_v22  ;;  %v664_v24 = vsel %vm632_vm0, %v554_v17, %v648_v21  ;;  %v651_v25 = vmul.f32 0.01, %v569_v20  ;;  %vm635_vm3 = vcmp.gt.f32.partialorder %v569_v20, 0.0  ;;  %2336 = vmatpush3.msra.mxu1 %v1897_v15  ;;  %v1894_v17 = vld [vmem:[%s3166_s1 + $0x180] sm:$0xff]  ;;  %2367 = vmatprep.subr.mxu0 %v1927_v18  ;;  %v1923_v22 = vld [vmem:[%s3166_s1 + $0x258] sm:$0xff] }
 0x1bd   : > { %v2239_v26 = vpop.f32.mrf.mxu1  ;;  %2287 = vmatprep.mubr.f32.mxu0 %v664_v24  ;;  %v1924_v21 = vld [vmem:[%s3166_s1 + $0x260] sm:$0xff]  ;;  %v1921_v24 = vld [vmem:[%s3166_s1 + $0x248] sm:$0xff] }
 0x1be   : > { %v650_v28 = vmul.f32 0.01, %v564_v23  ;;  %v579_v29 = vadd.f32 %v2239_v26, %v2763_v13  ;;  %2288 = vmatmul.mubr.f32.vlgmr.msra.gmra.mxu0 %v665_v27  ;;  %vm634_vm2 = vcmp.gt.f32.partialorder %v564_v23, 0.0  ;;  %v667_v35 = vsel %vm635_vm3, %v569_v20, %v651_v25  ;;  %v1925_v20 = vld [vmem:[%s3166_s1 + $0x268] sm:$0xff]  ;;  %v1920_v25 = vld [vmem:[%s3166_s1 + $0x240] sm:$0xff]  ;;  %v1919_v26 = vld [vmem:[%s3166_s1 + $0x238] sm:$0xff] }
 0x1bf   : > { %v573_v30 = vpop.f32.mrf.mxu1  ;;  %2368 = vmatpush3.msra.mxu0 %v1927_v18  ;;  %v1918_v27 = vld [vmem:[%s3166_s1 + $0x230] sm:$0xff] }
 0x1c0   : > { %v574_v31 = vadd.f32 %v2763_v13, %v573_v30  ;;  %v666_v32 = vsel %vm634_vm2, %v564_v23, %v650_v28  ;;  %v653_v33 = vmul.f32 0.01, %v579_v29  ;;  %vm637_vm5 = vcmp.gt.f32.partialorder %v579_v29, 0.0  ;;  %2369 = vmatprep.subr.mxu0 %v1926_v19  ;;  %v1922_v23 = vld [vmem:[%s3166_s1 + $0x250] sm:$0xff]  ;;  %v1917_v28 = vld [vmem:[%s3166_s1 + $0x228] sm:$0xff] }
 0x1c1   : > { %v2242_v34 = vpop.f32.mrf.mxu1  ;;  %2290 = vmatprep.mubr.f32.mxu0 %v666_v32  ;;  %2370 = vmatpush3.msra.mxu0 %v1926_v19  ;;  %v2832_v30 = vld [vmem:[%s3167_s2 + $0x2] ss:$0 sm:$0xff] }
 0x1c2   : > { %v652_v36 = vmul.f32 0.01, %v574_v31  ;;  %v589_v37 = vadd.f32 %v2242_v34, %v2763_v13  ;;  %2291 = vmatmul.mubr.f32.gmra.mxu0 %v667_v35  ;;  %vm636_vm4 = vcmp.gt.f32.partialorder %v574_v31, 0.0  ;;  %v669_v43 = vsel %vm637_vm5, %v579_v29, %v653_v33  ;;  %2371 = vmatprep.subr.mxu0 %v1925_v20  ;;  %v1916_v29 = vld [vmem:[%s3166_s1 + $0x220] sm:$0xff] }
 0x1c3   : > { %v583_v38 = vpop.f32.mrf.mxu1  ;;  %2372 = vmatpush3.msra.mxu0 %v1925_v20 }
 0x1c4   : > { %v655_v39 = vmul.f32 0.01, %v589_v37  ;;  %v584_v40 = vadd.f32 %v2763_v13, %v583_v38  ;;  %v668_v41 = vsel %vm636_vm4, %v574_v31, %v652_v36  ;;  %vm639_vm6 = vcmp.gt.f32.partialorder %v589_v37, 0.0  ;;  %2373 = vmatprep.subr.mxu0 %v1924_v21 }
 0x1c5   : > { %v2245_v42 = vpop.f32.mrf.mxu1  ;;  %2293 = vmatprep.mubr.f32.mxu0 %v668_v41  ;;  %2374 = vmatpush3.msra.mxu0 %v1924_v21 }
 0x1c6   : > { %v654_v44 = vmul.f32 0.01, %v584_v40  ;;  %v599_v45 = vadd.f32 %v2245_v42, %v2763_v13  ;;  %2294 = vmatmul.mubr.f32.gmra.mxu0 %v669_v43  ;;  %vm638_vm7 = vcmp.gt.f32.partialorder %v584_v40, 0.0  ;;  %v671_v47 = vsel %vm639_vm6, %v589_v37, %v655_v39  ;;  %2375 = vmatprep.subr.mxu0 %v1923_v22 }
 0x1c7   : > { %v593_v46 = vpop.f32.mrf.mxu1  ;;  %2376 = vmatpush3.msra.mxu0 %v1923_v22 }
 0x1c8   : > { %v657_v48 = vmul.f32 0.01, %v599_v45  ;;  %v594_v49 = vadd.f32 %v2763_v13, %v593_v46  ;;  %v670_v50 = vsel %vm638_vm7, %v584_v40, %v654_v44  ;;  %vm641_vm8 = vcmp.gt.f32.partialorder %v599_v45, 0.0  ;;  %2377 = vmatprep.subr.mxu0 %v1922_v23 }
 0x1c9   : > { %v2248_v51 = vpop.f32.mrf.mxu1  ;;  %2296 = vmatprep.mubr.f32.mxu0 %v670_v50  ;;  %2378 = vmatpush3.msra.mxu0 %v1922_v23 }
 0x1ca   : > { %v656_v52 = vmul.f32 0.01, %v594_v49  ;;  %v609_v53 = vadd.f32 %v2248_v51, %v2763_v13  ;;  %2297 = vmatmul.mubr.f32.gmra.mxu0 %v671_v47  ;;  %vm640_vm9 = vcmp.gt.f32.partialorder %v594_v49, 0.0  ;;  %v673_v55 = vsel %vm641_vm8, %v599_v45, %v657_v48  ;;  %2379 = vmatprep.subr.mxu0 %v1921_v24 }
 0x1cb   : > { %v603_v54 = vpop.f32.mrf.mxu1  ;;  %2380 = vmatpush3.msra.mxu0 %v1921_v24 }
 0x1cc   : > { %v659_v56 = vmul.f32 0.01, %v609_v53  ;;  %v604_v57 = vadd.f32 %v2763_v13, %v603_v54  ;;  %v672_v58 = vsel %vm640_vm9, %v594_v49, %v656_v52  ;;  %vm643_vm10 = vcmp.gt.f32.partialorder %v609_v53, 0.0  ;;  %2381 = vmatprep.subr.mxu0 %v1920_v25 }
 0x1cd   : > { %v2251_v59 = vpop.f32.mrf.mxu1  ;;  %2299 = vmatprep.mubr.f32.mxu0 %v672_v58  ;;  %2382 = vmatpush3.msra.mxu0 %v1920_v25 }
 0x1ce   : > { %v658_v61 = vmul.f32 0.01, %v604_v57  ;;  %v619_v62 = vadd.f32 %v2251_v59, %v2763_v13  ;;  %2300 = vmatmul.mubr.f32.gmra.mxu0 %v673_v55  ;;  %vm642_vm11 = vcmp.gt.f32.partialorder %v604_v57, 0.0  ;;  %v675_v63 = vsel %vm643_vm10, %v609_v53, %v659_v56  ;;  %2383 = vmatprep.subr.mxu0 %v1919_v26 }
 0x1cf   : > { %v613_v60 = vpop.f32.mrf.mxu1  ;;  %2384 = vmatpush3.msra.mxu0 %v1919_v26 }
 0x1d0   : > { %v661_v0 = vmul.f32 0.01, %v619_v62  ;;  %v614_v1 = vadd.f32 %v2763_v13, %v613_v60  ;;  %v674_v2 = vsel %vm642_vm11, %v604_v57, %v658_v61  ;;  %vm645_vm12 = vcmp.gt.f32.partialorder %v619_v62, 0.0  ;;  %2385 = vmatprep.subr.mxu0 %v1918_v27 }
 0x1d1   : > { %v2254_v3 = vpop.f32.mrf.mxu1  ;;  %2302 = vmatprep.mubr.f32.mxu0 %v674_v2  ;;  %2386 = vmatpush3.msra.mxu0 %v1918_v27 }
 0x1d2   : > { %v660_v4 = vmul.f32 0.01, %v614_v1  ;;  %v629_v5 = vadd.f32 %v2254_v3, %v2763_v13  ;;  %2303 = vmatmul.mubr.f32.gmra.mxu0 %v675_v63  ;;  %vm644_vm13 = vcmp.gt.f32.partialorder %v614_v1, 0.0  ;;  %v677_v7 = vsel %vm645_vm12, %v619_v62, %v661_v0  ;;  %2387 = vmatprep.subr.mxu0 %v1917_v28 }
 0x1d3   : > { %v623_v6 = vpop.f32.mrf.mxu1  ;;  %2388 = vmatpush3.msra.mxu0 %v1917_v28 }
 0x1d4   : > { %v663_v8 = vmul.f32 0.01, %v629_v5  ;;  %v624_v9 = vadd.f32 %v2763_v13, %v623_v6  ;;  %v676_v10 = vsel %vm644_vm13, %v614_v1, %v660_v4  ;;  %vm647_vm14 = vcmp.gt.f32.partialorder %v629_v5, 0.0  ;;  %v1896_v13 = vld [vmem:[%s3166_s1 + $0x190] sm:$0xff]  ;;  %2389 = vmatprep.subr.mxu0 %v1916_v29 }
 0x1d5   : > { %2305 = vmatprep.mubr.f32.mxu0 %v676_v10  ;;  %2337 = vmatprep.subr.mxu1 %v1896_v13 }
 0x1d6   : > { %v662_v11 = vmul.f32 0.01, %v624_v9  ;;  %2306 = vmatmul.mubr.f32.gmra.mxu0 %v677_v7  ;;  %vm646_vm15 = vcmp.gt.f32.partialorder %v624_v9, 0.0  ;;  %v679_v12 = vsel %vm647_vm14, %v629_v5, %v663_v8  ;;  %2338 = vmatpush3.msra.mxu1 %v1896_v13 }
 0x1d7   : > { %2339 = vmatprep.subr.mxu1 %v1895_v16  ;;  %2390 = vmatpush3.msra.mxu0 %v1916_v29 }
 0x1d8   : > { %v678_v14 = vsel %vm646_vm15, %v624_v9, %v662_v11  ;;  %2340 = vmatpush3.msra.mxu1 %v1895_v16 }
 0x1d9   : > { %2308 = vmatprep.mubr.f32.mxu0 %v678_v14  ;;  %2341 = vmatprep.subr.mxu1 %v1894_v17 }
 0x1da   : > { %2309 = vmatmul.mubr.f32.gmra.mxu0 %v679_v12  ;;  %2342 = vmatpush3.msra.mxu1 %v1894_v17 }
 0x27e   : > { %v2289_v31 = vpop.f32.mrf.mxu0 }
 0x27f   : > { %v777_v32 = vadd.f32 %v2289_v31, %v2832_v30 }
 0x280   : > { %v771_v33 = vpop.f32.mrf.mxu0 }
 0x281   : > { %v772_v34 = vadd.f32 %v2832_v30, %v771_v33  ;;  %v867_v35 = vmul.f32 0.01, %v777_v32  ;;  %vm851_vm0 = vcmp.gt.f32.partialorder %v777_v32, 0.0  ;;  %v1913_v33 = vld [vmem:[%s3166_s1 + $0x208] sm:$0xff] }
 0x282   : > { %v2292_v36 = vpop.f32.mrf.mxu0 }
 0x283   : > { %v866_v37 = vmul.f32 0.01, %v772_v34  ;;  %v787_v38 = vadd.f32 %v2292_v36, %v2832_v30  ;;  %vm850_vm1 = vcmp.gt.f32.partialorder %v772_v34, 0.0  ;;  %v883_v42 = vsel %vm851_vm0, %v777_v32, %v867_v35  ;;  %v1915_v32 = vld [vmem:[%s3166_s1 + $0x218] sm:$0xff]  ;;  %v1944_v36 = vld [vmem:[%s3166_s1 + $0x2f0] sm:$0xff] }
 0x284   : > { %v781_v39 = vpop.f32.mrf.mxu0  ;;  %2391 = vmatprep.subr.mxu0 %v1915_v32  ;;  %v1945_v35 = vld [vmem:[%s3166_s1 + $0x2f8] sm:$0xff] }
 0x285   : > { %v782_v40 = vadd.f32 %v2832_v30, %v781_v39  ;;  %v882_v41 = vsel %vm850_vm1, %v772_v34, %v866_v37  ;;  %v869_v43 = vmul.f32 0.01, %v787_v38  ;;  %vm853_vm3 = vcmp.gt.f32.partialorder %v787_v38, 0.0  ;;  %2392 = vmatpush3.msra.mxu0 %v1915_v32  ;;  %v1912_v34 = vld [vmem:[%s3166_s1 + $0x200] sm:$0xff]  ;;  %2423 = vmatprep.subr.mxu1 %v1945_v35  ;;  %v1943_v37 = vld [vmem:[%s3166_s1 + $0x2e8] sm:$0xff]  ;;  %v1941_v39 = vld [vmem:[%s3166_s1 + $0x2d8] sm:$0xff] }
 0x286   : > { %v2295_v44 = vpop.f32.mrf.mxu0  ;;  %2343 = vmatprep.mubr.f32.mxu1 %v882_v41  ;;  %v1939_v41 = vld [vmem:[%s3166_s1 + $0x2c8] sm:$0xff] }
 0x287   : > { %v868_v45 = vmul.f32 0.01, %v782_v40  ;;  %v797_v46 = vadd.f32 %v2295_v44, %v2832_v30  ;;  %2344 = vmatmul.mubr.f32.vlgmr.msra.gmra.mxu1 %v883_v42  ;;  %vm852_vm2 = vcmp.gt.f32.partialorder %v782_v40, 0.0  ;;  %v885_v52 = vsel %vm853_vm3, %v787_v38, %v869_v43  ;;  %v1942_v38 = vld [vmem:[%s3166_s1 + $0x2e0] sm:$0xff]  ;;  %v1937_v43 = vld [vmem:[%s3166_s1 + $0x2b8] sm:$0xff]  ;;  %v1936_v44 = vld [vmem:[%s3166_s1 + $0x2b0] sm:$0xff] }
 0x288   : > { %v791_v47 = vpop.f32.mrf.mxu0  ;;  %2424 = vmatpush3.msra.mxu1 %v1945_v35  ;;  %v1938_v42 = vld [vmem:[%s3166_s1 + $0x2c0] sm:$0xff] }
 0x289   : > { %v792_v48 = vadd.f32 %v2832_v30, %v791_v47  ;;  %v884_v49 = vsel %vm852_vm2, %v782_v40, %v868_v45  ;;  %v871_v50 = vmul.f32 0.01, %v797_v46  ;;  %vm855_vm5 = vcmp.gt.f32.partialorder %v797_v46, 0.0  ;;  %2425 = vmatprep.subr.mxu1 %v1944_v36  ;;  %v1940_v40 = vld [vmem:[%s3166_s1 + $0x2d0] sm:$0xff]  ;;  %v1935_v45 = vld [vmem:[%s3166_s1 + $0x2a8] sm:$0xff] }
 0x28a   : > { %v2298_v51 = vpop.f32.mrf.mxu0  ;;  %2346 = vmatprep.mubr.f32.mxu1 %v884_v49  ;;  %2426 = vmatpush3.msra.mxu1 %v1944_v36  ;;  %v2901_v47 = vld [vmem:[%s3167_s2 + $0x3] ss:$0 sm:$0xff] }
 0x28b   : > { %v870_v53 = vmul.f32 0.01, %v792_v48  ;;  %v807_v54 = vadd.f32 %v2298_v51, %v2832_v30  ;;  %2347 = vmatmul.mubr.f32.gmra.mxu1 %v885_v52  ;;  %vm854_vm4 = vcmp.gt.f32.partialorder %v792_v48, 0.0  ;;  %v887_v61 = vsel %vm855_vm5, %v797_v46, %v871_v50  ;;  %2427 = vmatprep.subr.mxu1 %v1943_v37  ;;  %v1934_v46 = vld [vmem:[%s3166_s1 + $0x2a0] sm:$0xff] }
 0x28c   : > { %v801_v55 = vpop.f32.mrf.mxu0  ;;  %2428 = vmatpush3.msra.mxu1 %v1943_v37 }
 0x28d   : > { %v802_v56 = vadd.f32 %v2832_v30, %v801_v55  ;;  %v886_v57 = vsel %vm854_vm4, %v792_v48, %v870_v53  ;;  %v873_v58 = vmul.f32 0.01, %v807_v54  ;;  %vm857_vm7 = vcmp.gt.f32.partialorder %v807_v54, 0.0  ;;  %2429 = vmatprep.subr.mxu1 %v1942_v38 }
 0x28e   : > { %v2301_v59 = vpop.f32.mrf.mxu0  ;;  %2349 = vmatprep.mubr.f32.mxu1 %v886_v57  ;;  %2430 = vmatpush3.msra.mxu1 %v1942_v38 }
 0x28f   : > { %v872_v62 = vmul.f32 0.01, %v802_v56  ;;  %v817_v60 = vadd.f32 %v2301_v59, %v2832_v30  ;;  %2350 = vmatmul.mubr.f32.gmra.mxu1 %v887_v61  ;;  %vm856_vm6 = vcmp.gt.f32.partialorder %v802_v56, 0.0  ;;  %v889_v4 = vsel %vm857_vm7, %v807_v54, %v873_v58  ;;  %2431 = vmatprep.subr.mxu1 %v1941_v39 }
 0x290   : > { %v811_v63 = vpop.f32.mrf.mxu0  ;;  %2432 = vmatpush3.msra.mxu1 %v1941_v39 }
 0x291   : > { %v875_v0 = vmul.f32 0.01, %v817_v60  ;;  %v812_v1 = vadd.f32 %v2832_v30, %v811_v63  ;;  %v888_v2 = vsel %vm856_vm6, %v802_v56, %v872_v62  ;;  %vm859_vm8 = vcmp.gt.f32.partialorder %v817_v60, 0.0  ;;  %2433 = vmatprep.subr.mxu1 %v1940_v40 }
 0x292   : > { %v2304_v3 = vpop.f32.mrf.mxu0  ;;  %2352 = vmatprep.mubr.f32.mxu1 %v888_v2  ;;  %2434 = vmatpush3.msra.mxu1 %v1940_v40 }
 0x293   : > { %v874_v5 = vmul.f32 0.01, %v812_v1  ;;  %v827_v6 = vadd.f32 %v2304_v3, %v2832_v30  ;;  %2353 = vmatmul.mubr.f32.gmra.mxu1 %v889_v4  ;;  %vm858_vm9 = vcmp.gt.f32.partialorder %v812_v1, 0.0  ;;  %v891_v8 = vsel %vm859_vm8, %v817_v60, %v875_v0  ;;  %2435 = vmatprep.subr.mxu1 %v1939_v41 }
 0x294   : > { %v821_v7 = vpop.f32.mrf.mxu0  ;;  %2436 = vmatpush3.msra.mxu1 %v1939_v41 }
 0x295   : > { %v877_v9 = vmul.f32 0.01, %v827_v6  ;;  %v822_v10 = vadd.f32 %v2832_v30, %v821_v7  ;;  %v890_v11 = vsel %vm858_vm9, %v812_v1, %v874_v5  ;;  %vm861_vm10 = vcmp.gt.f32.partialorder %v827_v6, 0.0  ;;  %2437 = vmatprep.subr.mxu1 %v1938_v42 }
 0x296   : > { %v2307_v12 = vpop.f32.mrf.mxu0  ;;  %2355 = vmatprep.mubr.f32.mxu1 %v890_v11  ;;  %2438 = vmatpush3.msra.mxu1 %v1938_v42 }
 0x297   : > { %v876_v14 = vmul.f32 0.01, %v822_v10  ;;  %v837_v15 = vadd.f32 %v2307_v12, %v2832_v30  ;;  %2356 = vmatmul.mubr.f32.gmra.mxu1 %v891_v8  ;;  %vm860_vm11 = vcmp.gt.f32.partialorder %v822_v10, 0.0  ;;  %v893_v16 = vsel %vm861_vm10, %v827_v6, %v877_v9  ;;  %2439 = vmatprep.subr.mxu1 %v1937_v43 }
 0x298   : > { %v831_v13 = vpop.f32.mrf.mxu0  ;;  %2440 = vmatpush3.msra.mxu1 %v1937_v43 }
 0x299   : > { %v879_v17 = vmul.f32 0.01, %v837_v15  ;;  %v832_v18 = vadd.f32 %v2832_v30, %v831_v13  ;;  %v892_v19 = vsel %vm860_vm11, %v822_v10, %v876_v14  ;;  %vm863_vm12 = vcmp.gt.f32.partialorder %v837_v15, 0.0  ;;  %2441 = vmatprep.subr.mxu1 %v1936_v44 }
 0x29a   : > { %v2310_v20 = vpop.f32.mrf.mxu0  ;;  %2358 = vmatprep.mubr.f32.mxu1 %v892_v19  ;;  %2442 = vmatpush3.msra.mxu1 %v1936_v44 }
 0x29b   : > { %v878_v21 = vmul.f32 0.01, %v832_v18  ;;  %v847_v22 = vadd.f32 %v2310_v20, %v2832_v30  ;;  %2359 = vmatmul.mubr.f32.gmra.mxu1 %v893_v16  ;;  %vm862_vm13 = vcmp.gt.f32.partialorder %v832_v18, 0.0  ;;  %v895_v24 = vsel %vm863_vm12, %v837_v15, %v879_v17  ;;  %2443 = vmatprep.subr.mxu1 %v1935_v45 }
 0x29c   : > { %v841_v23 = vpop.f32.mrf.mxu0  ;;  %2444 = vmatpush3.msra.mxu1 %v1935_v45 }
 0x29d   : > { %v881_v25 = vmul.f32 0.01, %v847_v22  ;;  %v842_v26 = vadd.f32 %v2832_v30, %v841_v23  ;;  %v894_v27 = vsel %vm862_vm13, %v832_v18, %v878_v21  ;;  %vm865_vm14 = vcmp.gt.f32.partialorder %v847_v22, 0.0  ;;  %v1914_v30 = vld [vmem:[%s3166_s1 + $0x210] sm:$0xff]  ;;  %2445 = vmatprep.subr.mxu1 %v1934_v46 }
 0x29e   : > { %2361 = vmatprep.mubr.f32.mxu1 %v894_v27  ;;  %2393 = vmatprep.subr.mxu0 %v1914_v30 }
 0x29f   : > { %v880_v28 = vmul.f32 0.01, %v842_v26  ;;  %2362 = vmatmul.mubr.f32.gmra.mxu1 %v895_v24  ;;  %vm864_vm15 = vcmp.gt.f32.partialorder %v842_v26, 0.0  ;;  %v897_v29 = vsel %vm865_vm14, %v847_v22, %v881_v25  ;;  %2394 = vmatpush3.msra.mxu0 %v1914_v30 }
 0x2a0   : > { %2395 = vmatprep.subr.mxu0 %v1913_v33  ;;  %2446 = vmatpush3.msra.mxu1 %v1934_v46 }
 0x2a1   : > { %v896_v31 = vsel %vm864_vm15, %v842_v26, %v880_v28  ;;  %2396 = vmatpush3.msra.mxu0 %v1913_v33 }
 0x2a2   : > { %2364 = vmatprep.mubr.f32.mxu1 %v896_v31  ;;  %2397 = vmatprep.subr.mxu0 %v1912_v34 }
 0x2a3   : > { %2365 = vmatmul.mubr.f32.gmra.mxu1 %v897_v29  ;;  %2398 = vmatpush3.msra.mxu0 %v1912_v34 }
 0x347   : > { %v2345_v48 = vpop.f32.mrf.mxu1 }
 0x348   : > { %v995_v49 = vadd.f32 %v2345_v48, %v2901_v47 }
 0x349   : > { %v989_v50 = vpop.f32.mrf.mxu1 }
 0x34a   : > { %v990_v51 = vadd.f32 %v2901_v47, %v989_v50  ;;  %v1085_v52 = vmul.f32 0.01, %v995_v49  ;;  %vm1069_vm0 = vcmp.gt.f32.partialorder %v995_v49, 0.0  ;;  %v1931_v50 = vld [vmem:[%s3166_s1 + $0x288] sm:$0xff] }
 0x34b   : > { %v2348_v53 = vpop.f32.mrf.mxu1 }
 0x34c   : > { %v1084_v54 = vmul.f32 0.01, %v990_v51  ;;  %v1005_v55 = vadd.f32 %v2348_v53, %v2901_v47  ;;  %vm1068_vm1 = vcmp.gt.f32.partialorder %v990_v51, 0.0  ;;  %v1101_v59 = vsel %vm1069_vm0, %v995_v49, %v1085_v52  ;;  %v1933_v49 = vld [vmem:[%s3166_s1 + $0x298] sm:$0xff]  ;;  %v1582_v53 = vld [vmem:[%s3168_s3 + $0xf0] sm:$0xff] }
 0x34d   : > { %v999_v56 = vpop.f32.mrf.mxu1  ;;  %2447 = vmatprep.subr.mxu1 %v1933_v49  ;;  %v1583_v52 = vld [vmem:[%s3168_s3 + $0xf8] sm:$0xff] }
 0x34e   : > { %v1000_v57 = vadd.f32 %v2901_v47, %v999_v56  ;;  %v1100_v58 = vsel %vm1068_vm1, %v990_v51, %v1084_v54  ;;  %v1087_v61 = vmul.f32 0.01, %v1005_v55  ;;  %vm1071_vm3 = vcmp.gt.f32.partialorder %v1005_v55, 0.0  ;;  %2448 = vmatpush3.msra.mxu1 %v1933_v49  ;;  %v1930_v51 = vld [vmem:[%s3166_s1 + $0x280] sm:$0xff]  ;;  %v1581_v54 = vld [vmem:[%s3168_s3 + $0xe8] sm:$0xff]  ;;  %1596 = vmatprep.subr.mxu0 %v1583_v52  ;;  %v1579_v56 = vld [vmem:[%s3168_s3 + $0xd8] sm:$0xff] }
 0x34f   : > { %v2351_v62 = vpop.f32.mrf.mxu1  ;;  %2399 = vmatprep.mubr.f32.mxu0 %v1100_v58  ;;  %v1577_v58 = vld [vmem:[%s3168_s3 + $0xc8] sm:$0xff] }
 0x350   : > { %v1086_v60 = vmul.f32 0.01, %v1000_v57  ;;  %v1015_v63 = vadd.f32 %v2351_v62, %v2901_v47  ;;  %2400 = vmatmul.mubr.f32.vlgmr.msra.gmra.mxu0 %v1101_v59  ;;  %vm1070_vm2 = vcmp.gt.f32.partialorder %v1000_v57, 0.0  ;;  %v1103_v5 = vsel %vm1071_vm3, %v1005_v55, %v1087_v61  ;;  %v1580_v55 = vld [vmem:[%s3168_s3 + $0xe0] sm:$0xff]  ;;  %v1575_v61 = vld [vmem:[%s3168_s3 + $0xb8] sm:$0xff]  ;;  %v1574_v62 = vld [vmem:[%s3168_s3 + $0xb0] sm:$0xff] }
 0x351   : > { %v1009_v0 = vpop.f32.mrf.mxu1  ;;  %1597 = vmatpush1.msra.mxu0 %v1582_v53  ;;  %v1576_v59 = vld [vmem:[%s3168_s3 + $0xc0] sm:$0xff] }
 0x352   : > { %v1010_v1 = vadd.f32 %v2901_v47, %v1009_v0  ;;  %v1102_v2 = vsel %vm1070_vm2, %v1000_v57, %v1086_v60  ;;  %v1089_v3 = vmul.f32 0.01, %v1015_v63  ;;  %vm1073_vm5 = vcmp.gt.f32.partialorder %v1015_v63, 0.0  ;;  %1598 = vmatprep.subr.mxu0 %v1581_v54  ;;  %v1578_v57 = vld [vmem:[%s3168_s3 + $0xd0] sm:$0xff]  ;;  %v1573_v60 = vld [vmem:[%s3168_s3 + $0xa8] sm:$0xff]  ;;  %v1571_v0 = vld [vmem:[%s3168_s3 + $0x98] sm:$0xff] }
 0x353   : > { %v2354_v4 = vpop.f32.mrf.mxu1  ;;  %2402 = vmatprep.mubr.f32.mxu0 %v1102_v2  ;;  %1599 = vmatpush1.msra.mxu0 %v1580_v55  ;;  %v1569_v2 = vld [vmem:[%s3168_s3 + $0x88] sm:$0xff] }
 0x354   : > { %v1088_v6 = vmul.f32 0.01, %v1010_v1  ;;  %v1025_v7 = vadd.f32 %v2354_v4, %v2901_v47  ;;  %2403 = vmatmul.mubr.f32.gmra.mxu0 %v1103_v5  ;;  %vm1072_vm4 = vcmp.gt.f32.partialorder %v1010_v1, 0.0  ;;  %v1105_v14 = vsel %vm1073_vm5, %v1015_v63, %v1089_v3  ;;  %1600 = vmatprep.subr.mxu0 %v1579_v56  ;;  %v1572_v63 = vld [vmem:[%s3168_s3 + $0xa0] sm:$0xff]  ;;  %v1567_v4 = vld [vmem:[%s3168_s3 + $0x78] sm:$0xff]  ;;  %v1566_v5 = vld [vmem:[%s3168_s3 + $0x70] sm:$0xff] }
 0x355   : > { %v1019_v8 = vpop.f32.mrf.mxu1  ;;  %1601 = vmatpush1.msra.mxu0 %v1578_v57  ;;  %v1568_v3 = vld [vmem:[%s3168_s3 + $0x80] sm:$0xff] }
 0x356   : > { %v1020_v9 = vadd.f32 %v2901_v47, %v1019_v8  ;;  %v1104_v10 = vsel %vm1072_vm4, %v1010_v1, %v1088_v6  ;;  %v1091_v11 = vmul.f32 0.01, %v1025_v7  ;;  %vm1075_vm7 = vcmp.gt.f32.partialorder %v1025_v7, 0.0  ;;  %1602 = vmatprep.subr.mxu0 %v1577_v58  ;;  %v1570_v1 = vld [vmem:[%s3168_s3 + $0x90] sm:$0xff]  ;;  %v1565_v6 = vld [vmem:[%s3168_s3 + $0x68] sm:$0xff]  ;;  %v1563_v8 = vld [vmem:[%s3168_s3 + $0x58] sm:$0xff] }
 0x357   : > { %v2357_v12 = vpop.f32.mrf.mxu1  ;;  %2405 = vmatprep.mubr.f32.mxu0 %v1104_v10  ;;  %1603 = vmatpush1.msra.mxu0 %v1576_v59  ;;  %v1561_v10 = vld [vmem:[%s3168_s3 + $0x48] sm:$0xff] }
 0x358   : > { %v1090_v15 = vmul.f32 0.01, %v1020_v9  ;;  %v1035_v13 = vadd.f32 %v2357_v12, %v2901_v47  ;;  %2406 = vmatmul.mubr.f32.gmra.mxu0 %v1105_v14  ;;  %vm1074_vm6 = vcmp.gt.f32.partialorder %v1020_v9, 0.0  ;;  %v1107_v21 = vsel %vm1075_vm7, %v1025_v7, %v1091_v11  ;;  %1604 = vmatprep.subr.mxu0 %v1575_v61  ;;  %v1564_v7 = vld [vmem:[%s3168_s3 + $0x60] sm:$0xff]  ;;  %v1559_v12 = vld [vmem:[%s3168_s3 + $0x38] sm:$0xff] }
 0x359   : > { %v1029_v16 = vpop.f32.mrf.mxu1  ;;  %1605 = vmatpush1.msra.mxu0 %v1574_v62  ;;  %v1560_v11 = vld [vmem:[%s3168_s3 + $0x40] sm:$0xff] }
 0x35a   : > { %v1030_v17 = vadd.f32 %v2901_v47, %v1029_v16  ;;  %v1106_v18 = vsel %vm1074_vm6, %v1020_v9, %v1090_v15  ;;  %v1093_v19 = vmul.f32 0.01, %v1035_v13  ;;  %vm1077_vm9 = vcmp.gt.f32.partialorder %v1035_v13, 0.0  ;;  %1606 = vmatprep.subr.mxu0 %v1573_v60  ;;  %v1562_v9 = vld [vmem:[%s3168_s3 + $0x50] sm:$0xff]  ;;  %v3009_v14 = vld [vmem:[%s3167_s2 + $0x4] ss:$0 sm:$0xff] }
 0x35b   : > { %v2360_v20 = vpop.f32.mrf.mxu1  ;;  %2408 = vmatprep.mubr.f32.mxu0 %v1106_v18  ;;  %1607 = vmatpush1.msra.mxu0 %v1572_v63 }
 0x35c   : > { %v1092_v22 = vmul.f32 0.01, %v1030_v17  ;;  %v1045_v23 = vadd.f32 %v2360_v20, %v2901_v47  ;;  %2409 = vmatmul.mubr.f32.gmra.mxu0 %v1107_v21  ;;  %vm1076_vm8 = vcmp.gt.f32.partialorder %v1030_v17, 0.0  ;;  %v1109_v29 = vsel %vm1077_vm9, %v1035_v13, %v1093_v19  ;;  %1608 = vmatprep.subr.mxu0 %v1571_v0 }
 0x35d   : > { %v1039_v24 = vpop.f32.mrf.mxu1  ;;  %1609 = vmatpush1.msra.mxu0 %v1570_v1 }
 0x35e   : > { %v1095_v25 = vmul.f32 0.01, %v1045_v23  ;;  %v1040_v26 = vadd.f32 %v2901_v47, %v1039_v24  ;;  %v1108_v27 = vsel %vm1076_vm8, %v1030_v17, %v1092_v22  ;;  %vm1079_vm10 = vcmp.gt.f32.partialorder %v1045_v23, 0.0  ;;  %1610 = vmatprep.subr.mxu0 %v1569_v2 }
 0x35f   : > { %v2363_v28 = vpop.f32.mrf.mxu1  ;;  %2411 = vmatprep.mubr.f32.mxu0 %v1108_v27  ;;  %1611 = vmatpush1.msra.mxu0 %v1568_v3 }
 0x360   : > { %v1094_v31 = vmul.f32 0.01, %v1040_v26  ;;  %v1055_v32 = vadd.f32 %v2363_v28, %v2901_v47  ;;  %2412 = vmatmul.mubr.f32.gmra.mxu0 %v1109_v29  ;;  %vm1078_vm11 = vcmp.gt.f32.partialorder %v1040_v26, 0.0  ;;  %v1111_v33 = vsel %vm1079_vm10, %v1045_v23, %v1095_v25  ;;  %1612 = vmatprep.subr.mxu0 %v1567_v4 }
 0x361   : > { %v1049_v30 = vpop.f32.mrf.mxu1  ;;  %1613 = vmatpush1.msra.mxu0 %v1566_v5 }
 0x362   : > { %v1097_v34 = vmul.f32 0.01, %v1055_v32  ;;  %v1050_v35 = vadd.f32 %v2901_v47, %v1049_v30  ;;  %v1110_v36 = vsel %vm1078_vm11, %v1040_v26, %v1094_v31  ;;  %vm1081_vm12 = vcmp.gt.f32.partialorder %v1055_v32, 0.0  ;;  %1614 = vmatprep.subr.mxu0 %v1565_v6 }
 0x363   : > { %v2366_v37 = vpop.f32.mrf.mxu1  ;;  %2414 = vmatprep.mubr.f32.mxu0 %v1110_v36  ;;  %1615 = vmatpush1.msra.mxu0 %v1564_v7 }
 0x364   : > { %v1096_v38 = vmul.f32 0.01, %v1050_v35  ;;  %v1065_v39 = vadd.f32 %v2366_v37, %v2901_v47  ;;  %2415 = vmatmul.mubr.f32.gmra.mxu0 %v1111_v33  ;;  %vm1080_vm13 = vcmp.gt.f32.partialorder %v1050_v35, 0.0  ;;  %v1113_v41 = vsel %vm1081_vm12, %v1055_v32, %v1097_v34  ;;  %1616 = vmatprep.subr.mxu0 %v1563_v8 }
 0x365   : > { %v1059_v40 = vpop.f32.mrf.mxu1  ;;  %1617 = vmatpush1.msra.mxu0 %v1562_v9 }
 0x366   : > { %v1099_v42 = vmul.f32 0.01, %v1065_v39  ;;  %v1060_v43 = vadd.f32 %v2901_v47, %v1059_v40  ;;  %v1112_v44 = vsel %vm1080_vm13, %v1050_v35, %v1096_v38  ;;  %vm1083_vm14 = vcmp.gt.f32.partialorder %v1065_v39, 0.0  ;;  %v1932_v47 = vld [vmem:[%s3166_s1 + $0x290] sm:$0xff]  ;;  %1618 = vmatprep.subr.mxu0 %v1561_v10 }
 0x367   : > { %2417 = vmatprep.mubr.f32.mxu0 %v1112_v44  ;;  %2449 = vmatprep.subr.mxu1 %v1932_v47 }
 0x368   : > { %v1098_v45 = vmul.f32 0.01, %v1060_v43  ;;  %2418 = vmatmul.mubr.f32.gmra.mxu0 %v1113_v41  ;;  %vm1082_vm15 = vcmp.gt.f32.partialorder %v1060_v43, 0.0  ;;  %v1115_v46 = vsel %vm1083_vm14, %v1065_v39, %v1099_v42  ;;  %2450 = vmatpush3.msra.mxu1 %v1932_v47 }
 0x369   : > { %2451 = vmatprep.subr.mxu1 %v1931_v50  ;;  %1619 = vmatpush1.msra.mxu0 %v1560_v11 }
 0x36a   : > { %v1114_v48 = vsel %vm1082_vm15, %v1060_v43, %v1098_v45  ;;  %2452 = vmatpush3.msra.mxu1 %v1931_v50  ;;  %1620 = vmatprep.subr.mxu0 %v1559_v12 }
 0x36b   : > { %2420 = vmatprep.mubr.f32.mxu0 %v1114_v48  ;;  %2453 = vmatprep.subr.mxu1 %v1930_v51 }
 0x36c   : > { %2421 = vmatmul.mubr.f32.gmra.mxu0 %v1115_v46  ;;  %2454 = vmatpush3.msra.mxu1 %v1930_v51 }
 0x410   : > { %v2401_v15 = vpop.f32.mrf.mxu0 }
 0x411   : > { %v1213_v13 = vadd.f32 %v2401_v15, %v3009_v14 }
 0x412   : > { %v1207_v16 = vpop.f32.mrf.mxu0 }
 0x413   : > { %v1208_v17 = vadd.f32 %v3009_v14, %v1207_v16  ;;  %v1303_v18 = vmul.f32 0.01, %v1213_v13  ;;  %vm1287_vm0 = vcmp.gt.f32.partialorder %v1213_v13, 0.0  ;;  %v1557_v16 = vld [vmem:[%s3168_s3 + $0x28] sm:$0xff] }
 0x414   : > { %v2404_v19 = vpop.f32.mrf.mxu0 }
 0x415   : > { %v1302_v20 = vmul.f32 0.01, %v1208_v17  ;;  %v1223_v21 = vadd.f32 %v2404_v19, %v3009_v14  ;;  %vm1286_vm1 = vcmp.gt.f32.partialorder %v1208_v17, 0.0  ;;  %v1319_v25 = vsel %vm1287_vm0, %v1213_v13, %v1303_v18  ;;  %v1558_v13 = vld [vmem:[%s3168_s3 + $0x30] sm:$0xff]  ;;  %v1553_v19 = vld [vmem:[%s3168_s3 + $0x8] sm:$0xff] }
 0x416   : > { %v1217_v22 = vpop.f32.mrf.mxu0  ;;  %1621 = vmatpush1.msra.mxu0 %v1558_v13  ;;  %v1554_v18 = vld [vmem:[%s3168_s3 + $0x10] sm:$0xff] }
 0x417   : > { %v1218_v23 = vadd.f32 %v3009_v14, %v1217_v22  ;;  %v1318_v24 = vsel %vm1286_vm1, %v1208_v17, %v1302_v20  ;;  %v1305_v26 = vmul.f32 0.01, %v1223_v21  ;;  %vm1289_vm3 = vcmp.gt.f32.partialorder %v1223_v21, 0.0  ;;  %1622 = vmatprep.subr.mxu0 %v1557_v16  ;;  %v1555_v17 = vld [vmem:[%s3168_s3 + $0x18] sm:$0xff]  ;;  %v1552_v20 = vld [vmem:[%s3168_s3] sm:$0xff] }
 0x418   : > { %v2407_v27 = vpop.f32.mrf.mxu0  ;;  %2455 = vmatprep.mubr.f32.mxu1 %v1318_v24 }
 0x419   : > { %v1304_v28 = vmul.f32 0.01, %v1218_v23  ;;  %v1233_v29 = vadd.f32 %v2407_v27, %v3009_v14  ;;  %2456 = vmatmul.mubr.f32.vlgmr.msra.gmra.mxu1 %v1319_v25  ;;  %vm1288_vm2 = vcmp.gt.f32.partialorder %v1218_v23, 0.0  ;;  %v1321_v35 = vsel %vm1289_vm3, %v1223_v21, %v1305_v26 }
 0x41a   : > { %v1227_v31 = vpop.f32.mrf.mxu0  ;;  %v2496_v21 = vmov 0.0  }
 0x41b   : > { %v1228_v32 = vadd.f32 %v3009_v14, %v1227_v31  ;;  %v1320_v30 = vsel %vm1288_vm2, %v1218_v23, %v1304_v28  ;;  %v1307_v33 = vmul.f32 0.01, %v1233_v29  ;;  %vm1291_vm5 = vcmp.gt.f32.partialorder %v1233_v29, 0.0  ;;  %1660 = vmatprep.mubr.f32.mxu0 %v2496_v21  ;;  %v3052_v23 = vld [vmem:[%s3167_s2 + $0x5] ss:$0 sm:$0xff] }
 0x41c   : > { %v2410_v34 = vpop.f32.mrf.mxu0  ;;  %2458 = vmatprep.mubr.f32.mxu1 %v1320_v30 }
 0x41d   : > { %v1306_v36 = vmul.f32 0.01, %v1228_v32  ;;  %v1243_v37 = vadd.f32 %v2410_v34, %v3009_v14  ;;  %2459 = vmatmul.mubr.f32.gmra.mxu1 %v1321_v35  ;;  %vm1290_vm4 = vcmp.gt.f32.partialorder %v1228_v32, 0.0  ;;  %v1323_v43 = vsel %vm1291_vm5, %v1233_v29, %v1307_v33 }
 0x41e   : > { %v1237_v38 = vpop.f32.mrf.mxu0 }
 0x41f   : > { %v1238_v39 = vadd.f32 %v3009_v14, %v1237_v38  ;;  %v1322_v40 = vsel %vm1290_vm4, %v1228_v32, %v1306_v36  ;;  %v1309_v41 = vmul.f32 0.01, %v1243_v37  ;;  %vm1293_vm7 = vcmp.gt.f32.partialorder %v1243_v37, 0.0 }
 0x420   : > { %v2413_v42 = vpop.f32.mrf.mxu0  ;;  %2461 = vmatprep.mubr.f32.mxu1 %v1322_v40 }
 0x421   : > { %v1308_v44 = vmul.f32 0.01, %v1238_v39  ;;  %v1253_v45 = vadd.f32 %v2413_v42, %v3009_v14  ;;  %2462 = vmatmul.mubr.f32.gmra.mxu1 %v1323_v43  ;;  %vm1292_vm6 = vcmp.gt.f32.partialorder %v1238_v39, 0.0  ;;  %v1325_v51 = vsel %vm1293_vm7, %v1243_v37, %v1309_v41 }
 0x422   : > { %v1247_v46 = vpop.f32.mrf.mxu0 }
 0x423   : > { %v1248_v48 = vadd.f32 %v3009_v14, %v1247_v46  ;;  %v1324_v49 = vsel %vm1292_vm6, %v1238_v39, %v1308_v44  ;;  %v1311_v47 = vmul.f32 0.01, %v1253_v45  ;;  %vm1295_vm9 = vcmp.gt.f32.partialorder %v1253_v45, 0.0 }
 0x424   : > { %v2416_v50 = vpop.f32.mrf.mxu0  ;;  %2464 = vmatprep.mubr.f32.mxu1 %v1324_v49 }
 0x425   : > { %v1310_v52 = vmul.f32 0.01, %v1248_v48  ;;  %v1263_v53 = vadd.f32 %v2416_v50, %v3009_v14  ;;  %2465 = vmatmul.mubr.f32.gmra.mxu1 %v1325_v51  ;;  %vm1294_vm8 = vcmp.gt.f32.partialorder %v1248_v48, 0.0  ;;  %v1327_v59 = vsel %vm1295_vm9, %v1253_v45, %v1311_v47 }
 0x426   : > { %v1257_v54 = vpop.f32.mrf.mxu0 }
 0x427   : > { %v1258_v55 = vadd.f32 %v3009_v14, %v1257_v54  ;;  %v1326_v56 = vsel %vm1294_vm8, %v1248_v48, %v1310_v52  ;;  %v1313_v57 = vmul.f32 0.01, %v1263_v53  ;;  %vm1297_vm11 = vcmp.gt.f32.partialorder %v1263_v53, 0.0 }
 0x428   : > { %v2419_v58 = vpop.f32.mrf.mxu0  ;;  %2467 = vmatprep.mubr.f32.mxu1 %v1326_v56 }
 0x429   : > { %v1312_v61 = vmul.f32 0.01, %v1258_v55  ;;  %v1273_v62 = vadd.f32 %v2419_v58, %v3009_v14  ;;  %2468 = vmatmul.mubr.f32.gmra.mxu1 %v1327_v59  ;;  %vm1296_vm10 = vcmp.gt.f32.partialorder %v1258_v55, 0.0  ;;  %v1329_v3 = vsel %vm1297_vm11, %v1263_v53, %v1313_v57 }
 0x42a   : > { %v1267_v60 = vpop.f32.mrf.mxu0 }
 0x42b   : > { %v1315_v63 = vmul.f32 0.01, %v1273_v62  ;;  %v1268_v0 = vadd.f32 %v3009_v14, %v1267_v60  ;;  %v1328_v1 = vsel %vm1296_vm10, %v1258_v55, %v1312_v61  ;;  %vm1299_vm12 = vcmp.gt.f32.partialorder %v1273_v62, 0.0 }
 0x42c   : > { %v2422_v2 = vpop.f32.mrf.mxu0  ;;  %2470 = vmatprep.mubr.f32.mxu1 %v1328_v1 }
 0x42d   : > { %v1314_v4 = vmul.f32 0.01, %v1268_v0  ;;  %v1283_v5 = vadd.f32 %v2422_v2, %v3009_v14  ;;  %2471 = vmatmul.mubr.f32.gmra.mxu1 %v1329_v3  ;;  %vm1298_vm13 = vcmp.gt.f32.partialorder %v1268_v0, 0.0  ;;  %v1331_v7 = vsel %vm1299_vm12, %v1273_v62, %v1315_v63 }
 0x42e   : > { %v1277_v6 = vpop.f32.mrf.mxu0 }
 0x42f   : > { %v1317_v8 = vmul.f32 0.01, %v1283_v5  ;;  %v1278_v9 = vadd.f32 %v3009_v14, %v1277_v6  ;;  %v1330_v10 = vsel %vm1298_vm13, %v1268_v0, %v1314_v4  ;;  %vm1301_vm14 = vcmp.gt.f32.partialorder %v1283_v5, 0.0  ;;  %v1556_v14 = vld [vmem:[%s3168_s3 + $0x20] sm:$0xff] }
 0x430   : > { %2473 = vmatprep.mubr.f32.mxu1 %v1330_v10  ;;  %1623 = vmatpush1.msra.mxu0 %v1556_v14 }
 0x431   : > { %v1316_v11 = vmul.f32 0.01, %v1278_v9  ;;  %2474 = vmatmul.mubr.f32.gmra.mxu1 %v1331_v7  ;;  %vm1300_vm15 = vcmp.gt.f32.partialorder %v1278_v9, 0.0  ;;  %v1333_v12 = vsel %vm1301_vm14, %v1283_v5, %v1317_v8  ;;  %1624 = vmatprep.subr.mxu0 %v1555_v17 }
 0x432   : > { %1625 = vmatpush1.msra.mxu0 %v1554_v18 }
 0x433   : > { %v1332_v15 = vsel %vm1300_vm15, %v1278_v9, %v1316_v11  ;;  %1626 = vmatprep.subr.mxu0 %v1553_v19 }
 0x434   : > { %2476 = vmatprep.mubr.f32.mxu1 %v1332_v15  ;;  %1627 = vmatpush1.msra.mxu0 %v1552_v20 }
 0x435   : > { %2477 = vmatmul.mubr.f32.gmra.mxu1 %v1333_v12 }
 0x4d9   : > { %v2457_v22 = vpop.f32.mrf.mxu1 }
 0x4da   : > { %v1431_v25 = vadd.f32 %v2457_v22, %v3052_v23 }
 0x4db   : > { %v1425_v24 = vpop.f32.mrf.mxu1 }
 0x4dc   : > { %v1426_v26 = vadd.f32 %v3052_v23, %v1425_v24  ;;  %v1521_v31 = vmul.f32 0.01, %v1431_v25  ;;  %vm1505_vm1 = vcmp.gt.f32.partialorder %v1431_v25, 0.0 }
 0x4dd   : > { %v2460_v27 = vpop.f32.mrf.mxu1 }
 0x4de   : > { %vm1504_vm0 = vcmp.gt.f32.partialorder %v1426_v26, 0.0  ;;  %v1520_v28 = vmul.f32 0.01, %v1426_v26  ;;  %v1441_v34 = vadd.f32 %v2460_v27, %v3052_v23  ;;  %v1537_v36 = vsel %vm1505_vm1, %v1431_v25, %v1521_v31 }
 0x4df   : > { %v1435_v29 = vpop.f32.mrf.mxu1  ;;  %v1586_v25 = vlaneseq }
 0x4e0   : > { %v1536_v32 = vsel %vm1504_vm0, %v1426_v26, %v1520_v28  ;;  %v1436_v30 = vadd.f32 %v3052_v23, %v1435_v29  ;;  %v1523_v38 = vmul.f32 0.01, %v1441_v34  ;;  %vm1507_vm3 = vcmp.gt.f32.partialorder %v1441_v34, 0.0 }
 0x4e1   : > { %v2463_v33 = vpop.f32.mrf.mxu1  ;;  %1661 = vmatmul.mubr.f32.vlgmr.msra.gmra.mxu0 %v1536_v32  ;;  %v1587_v26 = vshrl.u32 %v1586_v25, 7 }
 0x4e2   : > { %1666 = vmatprep.mubr.f32.mxu0 %v2496_v21  ;;  %v1522_v35 = vmul.f32 0.01, %v1436_v30  ;;  %vm1506_vm2 = vcmp.gt.f32.partialorder %v1436_v30, 0.0  ;;  %v1451_v42 = vadd.f32 %v2463_v33, %v3052_v23  ;;  %v1539_v44 = vsel %vm1507_vm3, %v1441_v34, %v1523_v38 }
 0x4e3   : > { %v1445_v37 = vpop.f32.mrf.mxu1  ;;  %v1588_v27 = vsub.s32 0, %v1587_v26  ;;  %v1592_v28 = vsub.s32 1, %v1587_v26 }
 0x4e4   : > { %v1446_v39 = vadd.f32 %v3052_v23, %v1445_v37  ;;  %v1538_v40 = vsel %vm1506_vm2, %v1436_v30, %v1522_v35  ;;  %v1525_v46 = vmul.f32 0.01, %v1451_v42  ;;  %vm1509_vm5 = vcmp.gt.f32.partialorder %v1451_v42, 0.0 }
 0x4e5   : > { %1667 = vmatmul.mubr.f32.gmra.mxu0 %v1537_v36  ;;  %v2466_v41 = vpop.f32.mrf.mxu1 }
 0x4e6   : > { %1672 = vmatprep.mubr.f32.mxu0 %v2496_v21  ;;  %v1524_v43 = vmul.f32 0.01, %v1446_v39  ;;  %vm1508_vm4 = vcmp.gt.f32.partialorder %v1446_v39, 0.0  ;;  %v1461_v50 = vadd.f32 %v2466_v41, %v3052_v23  ;;  %v1541_v52 = vsel %vm1509_vm5, %v1451_v42, %v1525_v46 }
 0x4e7   : > { %v1455_v45 = vpop.f32.mrf.mxu1 }
 0x4e8   : > { %v1456_v48 = vadd.f32 %v3052_v23, %v1455_v45  ;;  %v1540_v49 = vsel %vm1508_vm4, %v1446_v39, %v1524_v43  ;;  %v1527_v54 = vmul.f32 0.01, %v1461_v50  ;;  %vm1511_vm7 = vcmp.gt.f32.partialorder %v1461_v50, 0.0 }
 0x4e9   : > { %1673 = vmatmul.mubr.f32.gmra.mxu0 %v1538_v40  ;;  %v2469_v47 = vpop.f32.mrf.mxu1 }
 0x4ea   : > { %1678 = vmatprep.mubr.f32.mxu0 %v2496_v21  ;;  %v1526_v51 = vmul.f32 0.01, %v1456_v48  ;;  %vm1510_vm6 = vcmp.gt.f32.partialorder %v1456_v48, 0.0  ;;  %v1471_v58 = vadd.f32 %v2469_v47, %v3052_v23  ;;  %v1543_v61 = vsel %vm1511_vm7, %v1461_v50, %v1527_v54 }
 0x4eb   : > { %v1465_v53 = vpop.f32.mrf.mxu1 }
 0x4ec   : > { %v1466_v55 = vadd.f32 %v3052_v23, %v1465_v53  ;;  %v1542_v56 = vsel %vm1510_vm6, %v1456_v48, %v1526_v51  ;;  %v1529_v60 = vmul.f32 0.01, %v1471_v58  ;;  %vm1513_vm9 = vcmp.gt.f32.partialorder %v1471_v58, 0.0 }
 0x4ed   : > { %1679 = vmatmul.mubr.f32.gmra.mxu0 %v1539_v44  ;;  %v2472_v57 = vpop.f32.mrf.mxu1 }
 0x4ee   : > { %1684 = vmatprep.mubr.f32.mxu0 %v2496_v21  ;;  %v1528_v59 = vmul.f32 0.01, %v1466_v55  ;;  %vm1512_vm8 = vcmp.gt.f32.partialorder %v1466_v55, 0.0  ;;  %v1481_v2 = vadd.f32 %v2472_v57, %v3052_v23  ;;  %v1545_v4 = vsel %vm1513_vm9, %v1471_v58, %v1529_v60 }
 0x4ef   : > { %v1475_v62 = vpop.f32.mrf.mxu1 }
 0x4f0   : > { %v1476_v63 = vadd.f32 %v3052_v23, %v1475_v62  ;;  %v1544_v0 = vsel %vm1512_vm8, %v1466_v55, %v1528_v59  ;;  %v1531_v6 = vmul.f32 0.01, %v1481_v2  ;;  %vm1515_vm11 = vcmp.gt.f32.partialorder %v1481_v2, 0.0 }
 0x4f1   : > { %1685 = vmatmul.mubr.f32.gmra.mxu0 %v1540_v49  ;;  %v2475_v1 = vpop.f32.mrf.mxu1 }
 0x4f2   : > { %1690 = vmatprep.mubr.f32.mxu0 %v2496_v21  ;;  %v1530_v3 = vmul.f32 0.01, %v1476_v63  ;;  %vm1514_vm10 = vcmp.gt.f32.partialorder %v1476_v63, 0.0  ;;  %v1491_v10 = vadd.f32 %v2475_v1, %v3052_v23  ;;  %v1547_v12 = vsel %vm1515_vm11, %v1481_v2, %v1531_v6 }
 0x4f3   : > { %v1485_v5 = vpop.f32.mrf.mxu1 }
 0x4f4   : > { %v1486_v7 = vadd.f32 %v3052_v23, %v1485_v5  ;;  %v1546_v8 = vsel %vm1514_vm10, %v1476_v63, %v1530_v3  ;;  %v1533_v13 = vmul.f32 0.01, %v1491_v10  ;;  %vm1517_vm13 = vcmp.gt.f32.partialorder %v1491_v10, 0.0 }
 0x4f5   : > { %1691 = vmatmul.mubr.f32.gmra.mxu0 %v1541_v52  ;;  %v2478_v9 = vpop.f32.mrf.mxu1 }
 0x4f6   : > { %1696 = vmatprep.mubr.f32.mxu0 %v2496_v21  ;;  %v1532_v11 = vmul.f32 0.01, %v1486_v7  ;;  %vm1516_vm12 = vcmp.gt.f32.partialorder %v1486_v7, 0.0  ;;  %v1501_v17 = vadd.f32 %v2478_v9, %v3052_v23  ;;  %v1549_v19 = vsel %vm1517_vm13, %v1491_v10, %v1533_v13 }
 0x4f7   : > { %v1495_v15 = vpop.f32.mrf.mxu1 }
 0x4f8   : > { %v1496_v16 = vadd.f32 %v3052_v23, %v1495_v15  ;;  %v1548_v14 = vsel %vm1516_vm12, %v1486_v7, %v1532_v11  ;;  %v1535_v20 = vmul.f32 0.01, %v1501_v17  ;;  %vm1519_vm15 = vcmp.gt.f32.partialorder %v1501_v17, 0.0  ;;  %v1584_v23 = vld [vmem:[%s3169_s4] sm:$0x3] }
 0x4f9   : > { %1697 = vmatmul.mubr.f32.gmra.mxu0 %v1542_v56  ;;  %v3089_v29 = vrot.slane %v1584_v23, %v1588_v27  ;;  %v3091_v31 = vrot.slane %v1584_v23, %v1592_v28 }
 0x4fa   : > { %1702 = vmatprep.mubr.f32.mxu0 %v2496_v21  ;;  %v1534_v18 = vmul.f32 0.01, %v1496_v16  ;;  %vm1518_vm14 = vcmp.gt.f32.partialorder %v1496_v16, 0.0  ;;  %v1551_v24 = vsel %vm1519_vm15, %v1501_v17, %v1535_v20 }
 0x4fc   : > { %v1550_v22 = vsel %vm1518_vm14, %v1496_v16, %v1534_v18 }
 0x4fd   : > { %1703 = vmatmul.mubr.f32.gmra.mxu0 %v1543_v61 }
 0x4fe   : > { %1708 = vmatprep.mubr.f32.mxu0 %v2496_v21 }
 0x501   : > { %1709 = vmatmul.mubr.f32.gmra.mxu0 %v1544_v0 }
 0x502   : > { %1714 = vmatprep.mubr.f32.mxu0 %v2496_v21 }
 0x505   : > { %1715 = vmatmul.mubr.f32.gmra.mxu0 %v1545_v4 }
 0x506   : > { %1720 = vmatprep.mubr.f32.mxu0 %v2496_v21 }
 0x509   : > { %1721 = vmatmul.mubr.f32.gmra.mxu0 %v1546_v8 }
 0x50a   : > { %1726 = vmatprep.mubr.f32.mxu0 %v2496_v21 }
 0x50d   : > { %1727 = vmatmul.mubr.f32.gmra.mxu0 %v1547_v12 }
 0x50e   : > { %1732 = vmatprep.mubr.f32.mxu0 %v2496_v21 }
 0x511   : > { %1733 = vmatmul.mubr.f32.gmra.mxu0 %v1548_v14 }
 0x512   : > { %1738 = vmatprep.mubr.f32.mxu0 %v2496_v21 }
 0x515   : > { %1739 = vmatmul.mubr.f32.gmra.mxu0 %v1549_v19 }
 0x516   : > { %1744 = vmatprep.mubr.f32.mxu0 %v2496_v21 }
 0x519   : > { %1745 = vmatmul.mubr.f32.gmra.mxu0 %v1550_v22 }
 0x51a   : > { %1750 = vmatprep.mubr.f32.mxu0 %v2496_v21 }
 0x51d   : > { %1751 = vmatmul.mubr.f32.gmra.mxu0 %v1551_v24 }
 0x5a1   : > { %v1662_v21 = vpop.f32.mrf.mxu0 }
 0x5a2   : > { %v1663_v32 = vadd.f32 %v1662_v21, %v3089_v29 }
 0x5a3   : > { %v1664_v30 = vpop.f32.mrf.mxu0 }
 0x5a4   : > { %1757 = vst [vmem:[%s3096_s22] sm:$0xff] %v1663_v32  ;;  %v1665_v33 = vadd.f32 %v1664_v30, %v3091_v31 }
 0x5a5   : > { %v1668_v34 = vpop.f32.mrf.mxu0 }
 0x5a6   : > { %1758 = vst [vmem:[%s3096_s22 + $0x8] sm:$0xff] %v1665_v33  ;;  %v1669_v35 = vadd.f32 %v1668_v34, %v3089_v29 }
 0x5a7   : > { %v1670_v36 = vpop.f32.mrf.mxu0 }
 0x5a8   : > { %1759 = vst [vmem:[%s3096_s22 + $0x10] sm:$0xff] %v1669_v35  ;;  %v1671_v37 = vadd.f32 %v1670_v36, %v3091_v31 }
 0x5a9   : > { %v1674_v38 = vpop.f32.mrf.mxu0 }
 0x5aa   : > { %1760 = vst [vmem:[%s3096_s22 + $0x18] sm:$0xff] %v1671_v37  ;;  %v1675_v39 = vadd.f32 %v1674_v38, %v3089_v29 }
 0x5ab   : > { %v1676_v40 = vpop.f32.mrf.mxu0 }
 0x5ac   : > { %1761 = vst [vmem:[%s3096_s22 + $0x20] sm:$0xff] %v1675_v39  ;;  %v1677_v41 = vadd.f32 %v1676_v40, %v3091_v31 }
 0x5ad   : > { %v1680_v42 = vpop.f32.mrf.mxu0 }
 0x5ae   : > { %1762 = vst [vmem:[%s3096_s22 + $0x28] sm:$0xff] %v1677_v41  ;;  %v1681_v43 = vadd.f32 %v1680_v42, %v3089_v29 }
 0x5af   : > { %v1682_v44 = vpop.f32.mrf.mxu0 }
 0x5b0   : > { %1763 = vst [vmem:[%s3096_s22 + $0x30] sm:$0xff] %v1681_v43  ;;  %v1683_v45 = vadd.f32 %v1682_v44, %v3091_v31 }
 0x5b1   : > { %v1686_v46 = vpop.f32.mrf.mxu0 }
 0x5b2   : > { %1764 = vst [vmem:[%s3096_s22 + $0x38] sm:$0xff] %v1683_v45  ;;  %v1687_v48 = vadd.f32 %v1686_v46, %v3089_v29 }
 0x5b3   : > { %v1688_v49 = vpop.f32.mrf.mxu0 }
 0x5b4   : > { %1765 = vst [vmem:[%s3096_s22 + $0x40] sm:$0xff] %v1687_v48  ;;  %v1689_v47 = vadd.f32 %v1688_v49, %v3091_v31 }
 0x5b5   : > { %v1692_v50 = vpop.f32.mrf.mxu0 }
 0x5b6   : > { %1766 = vst [vmem:[%s3096_s22 + $0x48] sm:$0xff] %v1689_v47  ;;  %v1693_v51 = vadd.f32 %v1692_v50, %v3089_v29 }
 0x5b7   : > { %v1694_v52 = vpop.f32.mrf.mxu0 }
 0x5b8   : > { %1767 = vst [vmem:[%s3096_s22 + $0x50] sm:$0xff] %v1693_v51  ;;  %v1695_v53 = vadd.f32 %v1694_v52, %v3091_v31 }
 0x5b9   : > { %v1698_v54 = vpop.f32.mrf.mxu0 }
 0x5ba   : > { %1768 = vst [vmem:[%s3096_s22 + $0x58] sm:$0xff] %v1695_v53  ;;  %v1699_v55 = vadd.f32 %v1698_v54, %v3089_v29 }
 0x5bb   : > { %v1700_v56 = vpop.f32.mrf.mxu0 }
 0x5bc   : > { %1769 = vst [vmem:[%s3096_s22 + $0x60] sm:$0xff] %v1699_v55  ;;  %v1701_v57 = vadd.f32 %v1700_v56, %v3091_v31 }
 0x5bd   : > { %v1704_v58 = vpop.f32.mrf.mxu0 }
 0x5be   : > { %1770 = vst [vmem:[%s3096_s22 + $0x68] sm:$0xff] %v1701_v57  ;;  %v1705_v59 = vadd.f32 %v1704_v58, %v3089_v29 }
 0x5bf   : > { %v1706_v61 = vpop.f32.mrf.mxu0 }
 0x5c0   : > { %1771 = vst [vmem:[%s3096_s22 + $0x70] sm:$0xff] %v1705_v59  ;;  %v1707_v62 = vadd.f32 %v1706_v61, %v3091_v31 }
 0x5c1   : > { %v1710_v60 = vpop.f32.mrf.mxu0 }
 0x5c2   : > { %1772 = vst [vmem:[%s3096_s22 + $0x78] sm:$0xff] %v1707_v62  ;;  %v1711_v63 = vadd.f32 %v1710_v60, %v3089_v29 }
 0x5c3   : > { %v1712_v0 = vpop.f32.mrf.mxu0 }
 0x5c4   : > { %1773 = vst [vmem:[%s3096_s22 + $0x80] sm:$0xff] %v1711_v63  ;;  %v1713_v1 = vadd.f32 %v1712_v0, %v3091_v31 }
 0x5c5   : > { %v1716_v2 = vpop.f32.mrf.mxu0 }
 0x5c6   : > { %1774 = vst [vmem:[%s3096_s22 + $0x88] sm:$0xff] %v1713_v1  ;;  %v1717_v3 = vadd.f32 %v1716_v2, %v3089_v29 }
 0x5c7   : > { %v1718_v4 = vpop.f32.mrf.mxu0 }
 0x5c8   : > { %1775 = vst [vmem:[%s3096_s22 + $0x90] sm:$0xff] %v1717_v3  ;;  %v1719_v5 = vadd.f32 %v1718_v4, %v3091_v31 }
 0x5c9   : > { %v1722_v6 = vpop.f32.mrf.mxu0 }
 0x5ca   : > { %1776 = vst [vmem:[%s3096_s22 + $0x98] sm:$0xff] %v1719_v5  ;;  %v1723_v7 = vadd.f32 %v1722_v6, %v3089_v29 }
 0x5cb   : > { %v1724_v8 = vpop.f32.mrf.mxu0 }
 0x5cc   : > { %1777 = vst [vmem:[%s3096_s22 + $0xa0] sm:$0xff] %v1723_v7  ;;  %v1725_v9 = vadd.f32 %v1724_v8, %v3091_v31 }
 0x5cd   : > { %v1728_v10 = vpop.f32.mrf.mxu0 }
 0x5ce   : > { %1778 = vst [vmem:[%s3096_s22 + $0xa8] sm:$0xff] %v1725_v9  ;;  %v1729_v11 = vadd.f32 %v1728_v10, %v3089_v29 }
 0x5cf   : > { %v1730_v12 = vpop.f32.mrf.mxu0 }
 0x5d0   : > { %1779 = vst [vmem:[%s3096_s22 + $0xb0] sm:$0xff] %v1729_v11  ;;  %v1731_v15 = vadd.f32 %v1730_v12, %v3091_v31 }
 0x5d1   : > { %v1734_v13 = vpop.f32.mrf.mxu0 }
 0x5d2   : > { %1780 = vst [vmem:[%s3096_s22 + $0xb8] sm:$0xff] %v1731_v15  ;;  %v1735_v16 = vadd.f32 %v1734_v13, %v3089_v29 }
 0x5d3   : > { %v1736_v14 = vpop.f32.mrf.mxu0 }
 0x5d4   : > { %1781 = vst [vmem:[%s3096_s22 + $0xc0] sm:$0xff] %v1735_v16  ;;  %v1737_v17 = vadd.f32 %v1736_v14, %v3091_v31 }
 0x5d5   : > { %v1740_v18 = vpop.f32.mrf.mxu0 }
 0x5d6   : > { %1782 = vst [vmem:[%s3096_s22 + $0xc8] sm:$0xff] %v1737_v17  ;;  %v1741_v19 = vadd.f32 %v1740_v18, %v3089_v29 }
 0x5d7   : > { %v1742_v20 = vpop.f32.mrf.mxu0 }
 0x5d8   : > { %1783 = vst [vmem:[%s3096_s22 + $0xd0] sm:$0xff] %v1741_v19  ;;  %v1743_v22 = vadd.f32 %v1742_v20, %v3091_v31 }
 0x5d9   : > { %v1746_v24 = vpop.f32.mrf.mxu0 }
 0x5da   : > { %1784 = vst [vmem:[%s3096_s22 + $0xd8] sm:$0xff] %v1743_v22  ;;  %v1747_v25 = vadd.f32 %v1746_v24, %v3089_v29 }
 0x5db   : > { %v1748_v26 = vpop.f32.mrf.mxu0 }
 0x5dc   : > { %1785 = vst [vmem:[%s3096_s22 + $0xe0] sm:$0xff] %v1747_v25  ;;  %v1749_v27 = vadd.f32 %v1748_v26, %v3091_v31 }
 0x5dd   : > { %v1752_v23 = vpop.f32.mrf.mxu0 }
 0x5de   : > { %1786 = vst [vmem:[%s3096_s22 + $0xe8] sm:$0xff] %v1749_v27  ;;  %v1753_v28 = vadd.f32 %v1752_v23, %v3089_v29 }
 0x5df   : > { %v1754_v21 = vpop.f32.mrf.mxu0 }
 0x5e0   : > { %1787 = vst [vmem:[%s3096_s22 + $0xf0] sm:$0xff] %v1753_v28  ;;  %v1755_v32 = vadd.f32 %v1754_v21, %v3091_v31 }
 0x5e2   : > { %1788 = vst [vmem:[%s3096_s22 + $0xf8] sm:$0xff] %v1755_v32 }
 0x5e3 PF: > { %s15_s18 = sadd.s32 1, %s2494_s18  }
 0x5e4   : > { %p12_p4 = scmp.ge.s32.totalorder %s15_s18, 4  }
 0x5e6   :  { %14 = sbr.rel (!%p12_p4) target bundleno = 1 (0x1), region = 80 }

</bundles_post_ra>
